<compile_context>
chip_gen: v6e
topology: v6e:2x2x1
jax: 0.10.0
libtpu: 0.0.40
codegen_flags: <defaults>
</compile_context>

<pallas_src>
import jax
import jax.numpy as jnp
import numpy as np
from jax import lax
from jax.experimental import pallas as pl
from jax.experimental.pallas import tpu as pltpu

BN_EPS = 1e-5
LANE = 128      # f32 vreg lane width
SUBLANE = 8     # f32 vreg sublane count
HALO = 8        # W halo width in the padded scratch (sublane aligned)


def _round_up(x, m):
    return (x + m - 1) // m * m


# --------------------------------------------------------------------------- #
# Kernel
# --------------------------------------------------------------------------- #
def _downsample_ds_kernel(xp_ref, dw1_ref, pw1_ref, b1_ref,
                          dw2_ref, pw2_ref, b2_ref,
                          out_ref, pad1_ref, pad2_ref):
    """One batch tile per grid step.

    xp_ref  : (4, Bt, Hh, Wh, Cin) f32  -- the four stride-2 phases of the input
    dw*_ref : (9, C) f32                -- depthwise 3x3 taps, k = i*3 + j
    pw*_ref : (C, Opad) f32             -- pointwise weight * BN scale (lane padded)
    b*_ref  : (1, Opad) f32             -- fully folded bias (dw bias included)
    out_ref : (Bt*Hh*Wh, Cout_pad) f32
    pad1_ref: VMEM (Bt, Hh+2, Wh+16, Cin)      depthwise scratch, stage 1
    pad2_ref: VMEM (Bt, Hh+2, Wh+16, mid_pad)  depthwise scratch, stage 2
    """
    _, Bt, Hh, Wh, _ = xp_ref.shape
    M = Bt * Hh * Wh

    # ---- MaxPool2d(2): elementwise max of the four stride-2 phases ----------
    pooled = jnp.maximum(jnp.maximum(xp_ref[0], xp_ref[1]),
                         jnp.maximum(xp_ref[2], xp_ref[3]))   # (Bt, Hh, Wh, Cin)

    def ds_stage(pad_ref, interior, dw_ref, pw_ref, b_ref):
        """DSConv (3x3 depthwise + 1x1 pointwise) + folded BN + ReLU."""
        C = pad_ref.shape[3]
        Wp = pad_ref.shape[2]            # Wh + 2*HALO

        # Zero-padding writes: 5 stores, all (8,128)-aligned / unmasked.
        # Re-done every grid step -> safe under megacore "parallel" sharding.
        zrow = jnp.zeros((Bt, 1, Wp, C), jnp.float32)
        pad_ref[:, 0:1, :, :] = zrow                                   # top row
        pad_ref[:, Hh + 1:Hh + 2, :, :] = zrow                         # bottom row
        zcol = jnp.zeros((Bt, Hh, HALO, C), jnp.float32)
        pad_ref[:, 1:1 + Hh, 0:HALO, :] = zcol                         # left halo
        pad_ref[:, 1:1 + Hh, HALO + Wh:Wp, :] = zcol                   # right halo
        pad_ref[:, 1:1 + Hh, HALO:HALO + Wh, :] = interior             # interior

        # Depthwise 3x3 = per-tap per-channel scale: 9 shifted-window VPU FMAs.
        acc = None
        for k in range(9):
            i, j = divmod(k, 3)
            w0 = HALO - 1 + j                                          # 7, 8, 9
            slab = pad_ref[:, i:i + Hh, w0:w0 + Wh, :].reshape(M, C)
            term = slab * dw_ref[k:k + 1, :]
            acc = term if acc is None else acc + term

        # Pointwise 1x1 + folded inference BN: a single MXU matmul.
        y = jnp.dot(acc, pw_ref[...], preferred_element_type=jnp.float32)
        return jnp.maximum(y + b_ref[...], 0.0)                        # (M, Opad)

    h1 = ds_stage(pad1_ref, pooled, dw1_ref, pw1_ref, b1_ref)          # (M, mid_pad)
    mid_pad = pad2_ref.shape[3]
    out_ref[...] = ds_stage(pad2_ref, h1.reshape(Bt, Hh, Wh, mid_pad),
                            dw2_ref, pw2_ref, b2_ref)


# --------------------------------------------------------------------------- #
# Wrapper-side parameter folding and tiling
# --------------------------------------------------------------------------- #
def _fold_stage(dw_w, dw_b, pw_w, pw_b, gamma, beta, mean, var, in_pad, out_pad):
    """Fold DSConv (dw 3x3 + pw 1x1) + inference BN into:
       dw taps (9, in_pad), pointwise matrix (in_pad, out_pad), bias (1, out_pad).
       Padded rows/columns are zero, so padded lanes carry exact zeros."""
    C = dw_w.shape[0]
    O = pw_w.shape[0]
    dwt = jnp.transpose(dw_w[:, 0], (1, 2, 0)).reshape(9, C)          # dw[k, c], k=i*3+j
    scale = gamma / jnp.sqrt(var + BN_EPS)                            # (O,)
    pwm = pw_w[:, :, 0, 0].T * scale[None, :]                         # (C, O)
    b_eff = dw_b @ pwm + (pw_b - mean) * scale + beta                 # (O,)
    dwt_p = jnp.zeros((9, in_pad), jnp.float32).at[:, :C].set(dwt)
    pwm_p = jnp.zeros((in_pad, out_pad), jnp.float32).at[:C, :O].set(pwm)
    b_p = jnp.zeros((1, out_pad), jnp.float32).at[0, :O].set(b_eff)
    return dwt_p, pwm_p, b_p


def _vmem_bytes_estimate(bt, Hh, Wh, cin, mid_pad, cout_pad):
    """Kernel VMEM footprint: 2x double-buffered pipelined blocks + scratch,
    with (8, 128) sublane/lane padding applied."""
    f = 4
    lane = lambda c: _round_up(c, LANE)
    sub = lambda s: _round_up(s, SUBLANE)
    m_rows = bt * Hh * Wh
    in_blk = 4 * bt * Hh * sub(Wh) * lane(cin) * f
    out_blk = sub(m_rows) * lane(cout_pad) * f
    w_blk = (sub(9) * lane(cin) + sub(cin) * lane(mid_pad) + sub(1) * lane(mid_pad)
             + sub(9) * lane(mid_pad) + sub(mid_pad) * lane(cout_pad)
             + sub(1) * lane(cout_pad)) * f
    pipelined = 2 * (in_blk + out_blk + w_blk)          # double-buffered by Pallas
    scratch = bt * (Hh + 2) * sub(Wh + 2 * HALO) * (lane(cin) + lane(mid_pad)) * f
    return pipelined + scratch


def _pick_batch_tile(N, Hh, Wh, cin, mid_pad, cout_pad, budget):
    """Largest divisor of N that fits the VMEM budget, stopping once the matmul
    M dimension is comfortably sized (>= 512 rows)."""
    best = 1
    for bt in range(1, N + 1):
        if N % bt:
            continue
        if _vmem_bytes_estimate(bt, Hh, Wh, cin, mid_pad, cout_pad) > budget:
            break
        best = bt
        if bt * Hh * Wh >= 512:
            break
    return best


def downsample_ds(x_nchw, params, *, batch_tile=None):
    """Forward pass of DownsampleDS.  x_nchw: (N, Cin, H, W) -> (N, Cout, H/2, W/2)."""
    x = jnp.transpose(x_nchw, (0, 2, 3, 1)).astype(jnp.float32)       # NHWC
    N, H, W, Cin = x.shape
    assert H % 2 == 0 and W % 2 == 0, "spatial dims must be even for MaxPool2d(2)"
    Hh, Wh = H // 2, W // 2
    # Keep the pooled W dim (8,128)-aligned so in-kernel reshapes/stores stay free.
    # TODO(synk): pad Wh to a multiple of 8 instead of asserting.
    assert Wh % SUBLANE == 0, "W must be a multiple of 16"

    mid = params["pw1_w"].shape[0]
    Cout = params["pw2_w"].shape[0]
    mid_pad = _round_up(mid, LANE)
    cout_pad = _round_up(Cout, LANE)

    dw1, pw1, b1 = _fold_stage(params["dw1_w"], params["dw1_b"], params["pw1_w"],
                               params["pw1_b"], params["bn1_gamma"], params["bn1_beta"],
                               params["bn1_mean"], params["bn1_var"], Cin, mid_pad)
    dw2, pw2, b2 = _fold_stage(params["dw2_w"], params["dw2_b"], params["pw2_w"],
                               params["pw2_b"], params["bn2_gamma"], params["bn2_beta"],
                               params["bn2_mean"], params["bn2_var"], mid_pad, cout_pad)

    # MaxPool stride-2 phases stacked into a single input array (one DMA stream).
    xp = jnp.stack([x[:, 0::2, 0::2, :], x[:, 0::2, 1::2, :],
                    x[:, 1::2, 0::2, :], x[:, 1::2, 1::2, :]], axis=0)

    try:
        vmem_cap = pltpu.get_tpu_info().vmem_capacity_bytes
    except Exception:
        vmem_cap = 64 * 1024 * 1024            # conservative (v7x per-TensorCore)
    budget = int(vmem_cap * 0.45)

    bt = batch_tile or _pick_batch_tile(N, Hh, Wh, Cin, mid_pad, cout_pad, budget)
    assert N % bt == 0, "batch tile must divide N"
    m_rows = bt * Hh * Wh
    est = _vmem_bytes_estimate(bt, Hh, Wh, Cin, mid_pad, cout_pad)
    vmem_limit = int(min(vmem_cap * 0.9, max(32 * 1024 * 1024, 2 * est)))

    out2d = pl.pallas_call(
        _downsample_ds_kernel,
        out_shape=jax.ShapeDtypeStruct((N * Hh * Wh, cout_pad), jnp.float32),
        grid=(N // bt,),
        in_specs=[
            pl.BlockSpec((4, bt, Hh, Wh, Cin), lambda n: (0, n, 0, 0, 0)),
            pl.BlockSpec((9, Cin), lambda n: (0, 0)),
            pl.BlockSpec((Cin, mid_pad), lambda n: (0, 0)),
            pl.BlockSpec((1, mid_pad), lambda n: (0, 0)),
            pl.BlockSpec((9, mid_pad), lambda n: (0, 0)),
            pl.BlockSpec((mid_pad, cout_pad), lambda n: (0, 0)),
            pl.BlockSpec((1, cout_pad), lambda n: (0, 0)),
        ],
        out_specs=pl.BlockSpec((m_rows, cout_pad), lambda n: (n, 0)),
        scratch_shapes=[
            pltpu.VMEM((bt, Hh + 2, Wh + 2 * HALO, Cin), jnp.float32),
            pltpu.VMEM((bt, Hh + 2, Wh + 2 * HALO, mid_pad), jnp.float32),
        ],
        compiler_params=pltpu.CompilerParams(
            dimension_semantics=("parallel",),
            vmem_limit_bytes=vmem_limit),
    )(xp, dw1, pw1, b1, dw2, pw2, b2)

    out_nhwc = out2d[:, :Cout].reshape(N, Hh, Wh, Cout)
    return jnp.transpose(out_nhwc, (0, 3, 1, 2))                      # back to NCHW


# --------------------------------------------------------------------------- #
# Synthetic parameters and a pure-JAX reference
# --------------------------------------------------------------------------- #
def init_params(key, in_ch, out_ch):
    """Deterministic synthetic parameters matching DownsampleDS(in_ch, out_ch)."""
    mid = out_ch                                            # DualDSConv: mid_ch = out_ch
    ks = jax.random.split(key, 16)
    f32 = jnp.float32
    return {
        # stage 1 (DSConv in_ch -> mid)
        "dw1_w": 0.25 * jax.random.normal(ks[0], (in_ch, 1, 3, 3), f32),
        "dw1_b": 0.10 * jax.random.normal(ks[1], (in_ch,), f32),
        "pw1_w": 0.25 * jax.random.normal(ks[2], (mid, in_ch, 1, 1), f32),
        "pw1_b": 0.10 * jax.random.normal(ks[3], (mid,), f32),
        "bn1_gamma": 1.0 + 0.1 * jax.random.normal(ks[4], (mid,), f32),
        "bn1_beta": 0.1 * jax.random.normal(ks[5], (mid,), f32),
        "bn1_mean": 0.1 * jax.random.normal(ks[6], (mid,), f32),
        "bn1_var": 0.5 + 0.5 * jnp.abs(jax.random.normal(ks[7], (mid,), f32)),
        # stage 2 (DSConv mid -> out_ch)
        "dw2_w": 0.25 * jax.random.normal(ks[8], (mid, 1, 3, 3), f32),
        "dw2_b": 0.10 * jax.random.normal(ks[9], (mid,), f32),
        "pw2_w": 0.25 * jax.random.normal(ks[10], (out_ch, mid, 1, 1), f32),
        "pw2_b": 0.10 * jax.random.normal(ks[11], (out_ch,), f32),
        "bn2_gamma": 1.0 + 0.1 * jax.random.normal(ks[12], (out_ch,), f32),
        "bn2_beta": 0.1 * jax.random.normal(ks[13], (out_ch,), f32),
        "bn2_mean": 0.1 * jax.random.normal(ks[14], (out_ch,), f32),
        "bn2_var": 0.5 + 0.5 * jnp.abs(jax.random.normal(ks[15], (out_ch,), f32)),
    }


def reference(x_nchw, p):
    """Pure-JAX (XLA) reference of the same forward pass, for validation."""
    x = jnp.transpose(x_nchw, (0, 2, 3, 1)).astype(jnp.float32)
    pooled = lax.reduce_window(x, -jnp.inf, lax.max, (1, 2, 2, 1), (1, 2, 2, 1), "VALID")

    def stage(h, dw_w, dw_b, pw_w, pw_b, g, b, m, v):
        C = h.shape[-1]
        w_hwio = jnp.transpose(dw_w[:, 0], (1, 2, 0))[:, :, None, :]   # (3,3,1,C)
        dw = lax.conv_general_dilated(
            h, w_hwio, window_strides=(1, 1), padding="SAME",
            dimension_numbers=("NHWC", "HWIO", "NHWC"),
            feature_group_count=C,
            precision=lax.Precision.HIGHEST) + dw_b
        pw = jnp.einsum("nhwc,oc->nhwo", dw, pw_w[:, :, 0, 0],
                        precision=lax.Precision.HIGHEST) + pw_b
        y = (pw - m) / jnp.sqrt(v + BN_EPS) * g + b
        return jnp.maximum(y, 0.0)

    h = stage(pooled, p["dw1_w"], p["dw1_b"], p["pw1_w"], p["pw1_b"],
              p["bn1_gamma"], p["bn1_beta"], p["bn1_mean"], p["bn1_var"])
    h = stage(h, p["dw2_w"], p["dw2_b"], p["pw2_w"], p["pw2_b"],
              p["bn2_gamma"], p["bn2_beta"], p["bn2_mean"], p["bn2_var"])
    return jnp.transpose(h, (0, 3, 1, 2))


if __name__ == "__main__":
    key = jax.random.PRNGKey(0)
    N, Cin, H, W = 2, 4, 16, 16
    Cout = 8
    kx, kp = jax.random.split(key)
    x_nchw = jax.random.normal(kx, (N, Cin, H, W), dtype=jnp.float32)
    params = init_params(kp, Cin, Cout)

    out = jax.block_until_ready(downsample_ds(x_nchw, params))
    assert out.shape == (N, Cout, H // 2, W // 2)

    ref = jax.block_until_ready(reference(x_nchw, params))
    np.testing.assert_allclose(np.asarray(out), np.asarray(ref), rtol=5e-3, atol=5e-3)

    print("KERNEL_OK")
</pallas_src>

<mosaic_0001>
module attributes {stable_mosaic.version = 11 : i64} {
  func.func @_downsample_ds_kernel(%arg0: i32, %arg1: memref<4x2x8x8x4xf32, #tpu.memory_space<vmem>>, %arg2: memref<9x4xf32, #tpu.memory_space<vmem>>, %arg3: memref<4x128xf32, #tpu.memory_space<vmem>>, %arg4: memref<1x128xf32, #tpu.memory_space<vmem>>, %arg5: memref<9x128xf32, #tpu.memory_space<vmem>>, %arg6: memref<128x128xf32, #tpu.memory_space<vmem>>, %arg7: memref<1x128xf32, #tpu.memory_space<vmem>>, %arg8: memref<128x128xf32, #tpu.memory_space<vmem>>, %arg9: memref<2x10x24x4xf32, #tpu.memory_space<vmem>>, %arg10: memref<2x10x24x128xf32, #tpu.memory_space<vmem>>) attributes {dimension_semantics = [#tpu.dimension_semantics<parallel>], iteration_bounds = array<i64: 1>, scalar_prefetch = 0 : i64, scratch_operands = 2 : i64, tpu.core_type = #tpu.core_type<tc>, window_params = [{transform_indices = @transform_0, window_bounds = array<i64: 4, 2, 8, 8, 4>}, {pipeline_mode = #tpu.pipeline_mode<synchronous>, transform_indices = @transform_1, window_bounds = array<i64: 9, 4>}, {pipeline_mode = #tpu.pipeline_mode<synchronous>, transform_indices = @transform_2, window_bounds = array<i64: 4, 128>}, {pipeline_mode = #tpu.pipeline_mode<synchronous>, transform_indices = @transform_3, window_bounds = array<i64: 1, 128>}, {pipeline_mode = #tpu.pipeline_mode<synchronous>, transform_indices = @transform_4, window_bounds = array<i64: 9, 128>}, {pipeline_mode = #tpu.pipeline_mode<synchronous>, transform_indices = @transform_5, window_bounds = array<i64: 128, 128>}, {pipeline_mode = #tpu.pipeline_mode<synchronous>, transform_indices = @transform_6, window_bounds = array<i64: 1, 128>}, {transform_indices = @transform_7, window_bounds = array<i64: 128, 128>}]} {
    %c0 = arith.constant 0 : index
    %c0_0 = arith.constant 0 : index
    %c0_1 = arith.constant 0 : index
    %c0_2 = arith.constant 0 : index
    %c0_3 = arith.constant 0 : index
    %0 = vector.load %arg1[%c0, %c0_0, %c0_1, %c0_2, %c0_3] : memref<4x2x8x8x4xf32, #tpu.memory_space<vmem>>, vector<1x2x8x8x4xf32>
    %1 = vector.shape_cast %0 : vector<1x2x8x8x4xf32> to vector<2x8x8x4xf32>
    %c1 = arith.constant 1 : index
    %c0_4 = arith.constant 0 : index
    %c0_5 = arith.constant 0 : index
    %c0_6 = arith.constant 0 : index
    %c0_7 = arith.constant 0 : index
    %2 = vector.load %arg1[%c1, %c0_4, %c0_5, %c0_6, %c0_7] : memref<4x2x8x8x4xf32, #tpu.memory_space<vmem>>, vector<1x2x8x8x4xf32>
    %3 = vector.shape_cast %2 : vector<1x2x8x8x4xf32> to vector<2x8x8x4xf32>
    %4 = arith.maximumf %1, %3 : vector<2x8x8x4xf32>
    %c2 = arith.constant 2 : index
    %c0_8 = arith.constant 0 : index
    %c0_9 = arith.constant 0 : index
    %c0_10 = arith.constant 0 : index
    %c0_11 = arith.constant 0 : index
    %5 = vector.load %arg1[%c2, %c0_8, %c0_9, %c0_10, %c0_11] : memref<4x2x8x8x4xf32, #tpu.memory_space<vmem>>, vector<1x2x8x8x4xf32>
    %6 = vector.shape_cast %5 : vector<1x2x8x8x4xf32> to vector<2x8x8x4xf32>
    %c3 = arith.constant 3 : index
    %c0_12 = arith.constant 0 : index
    %c0_13 = arith.constant 0 : index
    %c0_14 = arith.constant 0 : index
    %c0_15 = arith.constant 0 : index
    %7 = vector.load %arg1[%c3, %c0_12, %c0_13, %c0_14, %c0_15] : memref<4x2x8x8x4xf32, #tpu.memory_space<vmem>>, vector<1x2x8x8x4xf32>
    %8 = vector.shape_cast %7 : vector<1x2x8x8x4xf32> to vector<2x8x8x4xf32>
    %9 = arith.maximumf %6, %8 : vector<2x8x8x4xf32>
    %10 = arith.maximumf %4, %9 : vector<2x8x8x4xf32>
    %cst = arith.constant 0.000000e+00 : f32
    %11 = vector.broadcast %cst : f32 to vector<2x1x24x4xf32>
    %c0_16 = arith.constant 0 : index
    %c0_17 = arith.constant 0 : index
    %c0_18 = arith.constant 0 : index
    %c0_19 = arith.constant 0 : index
    %12 = vector.load %arg9[%c0_16, %c0_17, %c0_18, %c0_19] : memref<2x10x24x4xf32, #tpu.memory_space<vmem>>, vector<2x1x24x4xf32>
    tpu.vector_store %arg9[%c0_16, %c0_17, %c0_18, %c0_19], %11 {strides = array<i32>} : memref<2x10x24x4xf32, #tpu.memory_space<vmem>>, vector<2x1x24x4xf32>,
    %c0_20 = arith.constant 0 : index
    %c9 = arith.constant 9 : index
    %c0_21 = arith.constant 0 : index
    %c0_22 = arith.constant 0 : index
    %13 = vector.load %arg9[%c0_20, %c9, %c0_21, %c0_22] : memref<2x10x24x4xf32, #tpu.memory_space<vmem>>, vector<2x1x24x4xf32>
    tpu.vector_store %arg9[%c0_20, %c9, %c0_21, %c0_22], %11 {strides = array<i32>} : memref<2x10x24x4xf32, #tpu.memory_space<vmem>>, vector<2x1x24x4xf32>,
    %cst_23 = arith.constant 0.000000e+00 : f32
    %14 = vector.broadcast %cst_23 : f32 to vector<2x8x8x4xf32>
    %c0_24 = arith.constant 0 : index
    %c1_25 = arith.constant 1 : index
    %c0_26 = arith.constant 0 : index
    %c0_27 = arith.constant 0 : index
    %15 = vector.load %arg9[%c0_24, %c1_25, %c0_26, %c0_27] : memref<2x10x24x4xf32, #tpu.memory_space<vmem>>, vector<2x8x8x4xf32>
    tpu.vector_store %arg9[%c0_24, %c1_25, %c0_26, %c0_27], %14 {strides = array<i32>} : memref<2x10x24x4xf32, #tpu.memory_space<vmem>>, vector<2x8x8x4xf32>,
    %c0_28 = arith.constant 0 : index
    %c1_29 = arith.constant 1 : index
    %c16 = arith.constant 16 : index
    %c0_30 = arith.constant 0 : index
    %16 = vector.load %arg9[%c0_28, %c1_29, %c16, %c0_30] : memref<2x10x24x4xf32, #tpu.memory_space<vmem>>, vector<2x8x8x4xf32>
    tpu.vector_store %arg9[%c0_28, %c1_29, %c16, %c0_30], %14 {strides = array<i32>} : memref<2x10x24x4xf32, #tpu.memory_space<vmem>>, vector<2x8x8x4xf32>,
    %c0_31 = arith.constant 0 : index
    %c1_32 = arith.constant 1 : index
    %c8 = arith.constant 8 : index
    %c0_33 = arith.constant 0 : index
    %17 = vector.load %arg9[%c0_31, %c1_32, %c8, %c0_33] : memref<2x10x24x4xf32, #tpu.memory_space<vmem>>, vector<2x8x8x4xf32>
    tpu.vector_store %arg9[%c0_31, %c1_32, %c8, %c0_33], %10 {strides = array<i32>} : memref<2x10x24x4xf32, #tpu.memory_space<vmem>>, vector<2x8x8x4xf32>,
    %c0_34 = arith.constant 0 : index
    %c0_35 = arith.constant 0 : index
    %c7 = arith.constant 7 : index
    %c0_36 = arith.constant 0 : index
    %18 = vector.load %arg9[%c0_34, %c0_35, %c7, %c0_36] : memref<2x10x24x4xf32, #tpu.memory_space<vmem>>, vector<2x8x8x4xf32>
    %19 = vector.shape_cast %18 : vector<2x8x8x4xf32> to vector<128x4xf32>
    %c0_37 = arith.constant 0 : index
    %c0_38 = arith.constant 0 : index
    %20 = vector.load %arg2[%c0_37, %c0_38] : memref<9x4xf32, #tpu.memory_space<vmem>>, vector<1x4xf32>
    %21 = vector.broadcast %20 : vector<1x4xf32> to vector<128x4xf32>
    %22 = arith.mulf %19, %21 : vector<128x4xf32>
    %c0_39 = arith.constant 0 : index
    %c0_40 = arith.constant 0 : index
    %c8_41 = arith.constant 8 : index
    %c0_42 = arith.constant 0 : index
    %23 = vector.load %arg9[%c0_39, %c0_40, %c8_41, %c0_42] : memref<2x10x24x4xf32, #tpu.memory_space<vmem>>, vector<2x8x8x4xf32>
    %24 = vector.shape_cast %23 : vector<2x8x8x4xf32> to vector<128x4xf32>
    %c1_43 = arith.constant 1 : index
    %c0_44 = arith.constant 0 : index
    %25 = vector.load %arg2[%c1_43, %c0_44] : memref<9x4xf32, #tpu.memory_space<vmem>>, vector<1x4xf32>
    %26 = vector.broadcast %25 : vector<1x4xf32> to vector<128x4xf32>
    %27 = arith.mulf %24, %26 : vector<128x4xf32>
    %28 = arith.addf %22, %27 : vector<128x4xf32>
    %c0_45 = arith.constant 0 : index
    %c0_46 = arith.constant 0 : index
    %c9_47 = arith.constant 9 : index
    %c0_48 = arith.constant 0 : index
    %29 = vector.load %arg9[%c0_45, %c0_46, %c9_47, %c0_48] : memref<2x10x24x4xf32, #tpu.memory_space<vmem>>, vector<2x8x8x4xf32>
    %30 = vector.shape_cast %29 : vector<2x8x8x4xf32> to vector<128x4xf32>
    %c2_49 = arith.constant 2 : index
    %c0_50 = arith.constant 0 : index
    %31 = vector.load %arg2[%c2_49, %c0_50] : memref<9x4xf32, #tpu.memory_space<vmem>>, vector<1x4xf32>
    %32 = vector.broadcast %31 : vector<1x4xf32> to vector<128x4xf32>
    %33 = arith.mulf %30, %32 : vector<128x4xf32>
    %34 = arith.addf %28, %33 : vector<128x4xf32>
    %c0_51 = arith.constant 0 : index
    %c1_52 = arith.constant 1 : index
    %c7_53 = arith.constant 7 : index
    %c0_54 = arith.constant 0 : index
    %35 = vector.load %arg9[%c0_51, %c1_52, %c7_53, %c0_54] : memref<2x10x24x4xf32, #tpu.memory_space<vmem>>, vector<2x8x8x4xf32>
    %36 = vector.shape_cast %35 : vector<2x8x8x4xf32> to vector<128x4xf32>
    %c3_55 = arith.constant 3 : index
    %c0_56 = arith.constant 0 : index
    %37 = vector.load %arg2[%c3_55, %c0_56] : memref<9x4xf32, #tpu.memory_space<vmem>>, vector<1x4xf32>
    %38 = vector.broadcast %37 : vector<1x4xf32> to vector<128x4xf32>
    %39 = arith.mulf %36, %38 : vector<128x4xf32>
    %40 = arith.addf %34, %39 : vector<128x4xf32>
    %c0_57 = arith.constant 0 : index
    %c1_58 = arith.constant 1 : index
    %c8_59 = arith.constant 8 : index
    %c0_60 = arith.constant 0 : index
    %41 = vector.load %arg9[%c0_57, %c1_58, %c8_59, %c0_60] : memref<2x10x24x4xf32, #tpu.memory_space<vmem>>, vector<2x8x8x4xf32>
    %42 = vector.shape_cast %41 : vector<2x8x8x4xf32> to vector<128x4xf32>
    %c4 = arith.constant 4 : index
    %c0_61 = arith.constant 0 : index
    %43 = vector.load %arg2[%c4, %c0_61] : memref<9x4xf32, #tpu.memory_space<vmem>>, vector<1x4xf32>
    %44 = vector.broadcast %43 : vector<1x4xf32> to vector<128x4xf32>
    %45 = arith.mulf %42, %44 : vector<128x4xf32>
    %46 = arith.addf %40, %45 : vector<128x4xf32>
    %c0_62 = arith.constant 0 : index
    %c1_63 = arith.constant 1 : index
    %c9_64 = arith.constant 9 : index
    %c0_65 = arith.constant 0 : index
    %47 = vector.load %arg9[%c0_62, %c1_63, %c9_64, %c0_65] : memref<2x10x24x4xf32, #tpu.memory_space<vmem>>, vector<2x8x8x4xf32>
    %48 = vector.shape_cast %47 : vector<2x8x8x4xf32> to vector<128x4xf32>
    %c5 = arith.constant 5 : index
    %c0_66 = arith.constant 0 : index
    %49 = vector.load %arg2[%c5, %c0_66] : memref<9x4xf32, #tpu.memory_space<vmem>>, vector<1x4xf32>
    %50 = vector.broadcast %49 : vector<1x4xf32> to vector<128x4xf32>
    %51 = arith.mulf %48, %50 : vector<128x4xf32>
    %52 = arith.addf %46, %51 : vector<128x4xf32>
    %c0_67 = arith.constant 0 : index
    %c2_68 = arith.constant 2 : index
    %c7_69 = arith.constant 7 : index
    %c0_70 = arith.constant 0 : index
    %53 = vector.load %arg9[%c0_67, %c2_68, %c7_69, %c0_70] : memref<2x10x24x4xf32, #tpu.memory_space<vmem>>, vector<2x8x8x4xf32>
    %54 = vector.shape_cast %53 : vector<2x8x8x4xf32> to vector<128x4xf32>
    %c6 = arith.constant 6 : index
    %c0_71 = arith.constant 0 : index
    %55 = vector.load %arg2[%c6, %c0_71] : memref<9x4xf32, #tpu.memory_space<vmem>>, vector<1x4xf32>
    %56 = vector.broadcast %55 : vector<1x4xf32> to vector<128x4xf32>
    %57 = arith.mulf %54, %56 : vector<128x4xf32>
    %58 = arith.addf %52, %57 : vector<128x4xf32>
    %c0_72 = arith.constant 0 : index
    %c2_73 = arith.constant 2 : index
    %c8_74 = arith.constant 8 : index
    %c0_75 = arith.constant 0 : index
    %59 = vector.load %arg9[%c0_72, %c2_73, %c8_74, %c0_75] : memref<2x10x24x4xf32, #tpu.memory_space<vmem>>, vector<2x8x8x4xf32>
    %60 = vector.shape_cast %59 : vector<2x8x8x4xf32> to vector<128x4xf32>
    %c7_76 = arith.constant 7 : index
    %c0_77 = arith.constant 0 : index
    %61 = vector.load %arg2[%c7_76, %c0_77] : memref<9x4xf32, #tpu.memory_space<vmem>>, vector<1x4xf32>
    %62 = vector.broadcast %61 : vector<1x4xf32> to vector<128x4xf32>
    %63 = arith.mulf %60, %62 : vector<128x4xf32>
    %64 = arith.addf %58, %63 : vector<128x4xf32>
    %c0_78 = arith.constant 0 : index
    %c2_79 = arith.constant 2 : index
    %c9_80 = arith.constant 9 : index
    %c0_81 = arith.constant 0 : index
    %65 = vector.load %arg9[%c0_78, %c2_79, %c9_80, %c0_81] : memref<2x10x24x4xf32, #tpu.memory_space<vmem>>, vector<2x8x8x4xf32>
    %66 = vector.shape_cast %65 : vector<2x8x8x4xf32> to vector<128x4xf32>
    %c8_82 = arith.constant 8 : index
    %c0_83 = arith.constant 0 : index
    %67 = vector.load %arg2[%c8_82, %c0_83] : memref<9x4xf32, #tpu.memory_space<vmem>>, vector<1x4xf32>
    %68 = vector.broadcast %67 : vector<1x4xf32> to vector<128x4xf32>
    %69 = arith.mulf %66, %68 : vector<128x4xf32>
    %70 = arith.addf %64, %69 : vector<128x4xf32>
    %c0_84 = arith.constant 0 : index
    %c0_85 = arith.constant 0 : index
    %71 = vector.load %arg3[%c0_84, %c0_85] : memref<4x128xf32, #tpu.memory_space<vmem>>, vector<4x128xf32>
    %cst_86 = arith.constant dense<0.000000e+00> : vector<128x128xf32>
    %72 = tpu.matmul %70, %71, %cst_86 {dimension_numbers = #tpu.dot_dimension_numbers<[1], [0], [0], [1], [0, 0, 1, 1], [], []>} : vector<128x4xf32>, vector<4x128xf32>, vector<128x128xf32> -> vector<128x128xf32>
    %c0_87 = arith.constant 0 : index
    %c0_88 = arith.constant 0 : index
    %73 = vector.load %arg4[%c0_87, %c0_88] : memref<1x128xf32, #tpu.memory_space<vmem>>, vector<1x128xf32>
    %74 = vector.broadcast %73 : vector<1x128xf32> to vector<128x128xf32>
    %75 = arith.addf %72, %74 : vector<128x128xf32>
    %cst_89 = arith.constant 0.000000e+00 : f32
    %76 = vector.broadcast %cst_89 : f32 to vector<128x128xf32>
    %77 = arith.maximumf %75, %76 : vector<128x128xf32>
    %78 = vector.shape_cast %77 : vector<128x128xf32> to vector<2x8x8x128xf32>
    %cst_90 = arith.constant 0.000000e+00 : f32
    %79 = vector.broadcast %cst_90 : f32 to vector<2x1x24x128xf32>
    %c0_91 = arith.constant 0 : index
    %c0_92 = arith.constant 0 : index
    %c0_93 = arith.constant 0 : index
    %c0_94 = arith.constant 0 : index
    %80 = vector.load %arg10[%c0_91, %c0_92, %c0_93, %c0_94] : memref<2x10x24x128xf32, #tpu.memory_space<vmem>>, vector<2x1x24x128xf32>
    tpu.vector_store %arg10[%c0_91, %c0_92, %c0_93, %c0_94], %79 {strides = array<i32>} : memref<2x10x24x128xf32, #tpu.memory_space<vmem>>, vector<2x1x24x128xf32>,
    %c0_95 = arith.constant 0 : index
    %c9_96 = arith.constant 9 : index
    %c0_97 = arith.constant 0 : index
    %c0_98 = arith.constant 0 : index
    %81 = vector.load %arg10[%c0_95, %c9_96, %c0_97, %c0_98] : memref<2x10x24x128xf32, #tpu.memory_space<vmem>>, vector<2x1x24x128xf32>
    tpu.vector_store %arg10[%c0_95, %c9_96, %c0_97, %c0_98], %79 {strides = array<i32>} : memref<2x10x24x128xf32, #tpu.memory_space<vmem>>, vector<2x1x24x128xf32>,
    %cst_99 = arith.constant 0.000000e+00 : f32
    %82 = vector.broadcast %cst_99 : f32 to vector<2x8x8x128xf32>
    %c0_100 = arith.constant 0 : index
    %c1_101 = arith.constant 1 : index
    %c0_102 = arith.constant 0 : index
    %c0_103 = arith.constant 0 : index
    %83 = vector.load %arg10[%c0_100, %c1_101, %c0_102, %c0_103] : memref<2x10x24x128xf32, #tpu.memory_space<vmem>>, vector<2x8x8x128xf32>
    tpu.vector_store %arg10[%c0_100, %c1_101, %c0_102, %c0_103], %82 {strides = array<i32>} : memref<2x10x24x128xf32, #tpu.memory_space<vmem>>, vector<2x8x8x128xf32>,
    %c0_104 = arith.constant 0 : index
    %c1_105 = arith.constant 1 : index
    %c16_106 = arith.constant 16 : index
    %c0_107 = arith.constant 0 : index
    %84 = vector.load %arg10[%c0_104, %c1_105, %c16_106, %c0_107] : memref<2x10x24x128xf32, #tpu.memory_space<vmem>>, vector<2x8x8x128xf32>
    tpu.vector_store %arg10[%c0_104, %c1_105, %c16_106, %c0_107], %82 {strides = array<i32>} : memref<2x10x24x128xf32, #tpu.memory_space<vmem>>, vector<2x8x8x128xf32>,
    %c0_108 = arith.constant 0 : index
    %c1_109 = arith.constant 1 : index
    %c8_110 = arith.constant 8 : index
    %c0_111 = arith.constant 0 : index
    %85 = vector.load %arg10[%c0_108, %c1_109, %c8_110, %c0_111] : memref<2x10x24x128xf32, #tpu.memory_space<vmem>>, vector<2x8x8x128xf32>
    tpu.vector_store %arg10[%c0_108, %c1_109, %c8_110, %c0_111], %78 {strides = array<i32>} : memref<2x10x24x128xf32, #tpu.memory_space<vmem>>, vector<2x8x8x128xf32>,
    %c0_112 = arith.constant 0 : index
    %c0_113 = arith.constant 0 : index
    %c7_114 = arith.constant 7 : index
    %c0_115 = arith.constant 0 : index
    %86 = vector.load %arg10[%c0_112, %c0_113, %c7_114, %c0_115] : memref<2x10x24x128xf32, #tpu.memory_space<vmem>>, vector<2x8x8x128xf32>
    %87 = vector.shape_cast %86 : vector<2x8x8x128xf32> to vector<128x128xf32>
    %c0_116 = arith.constant 0 : index
    %c0_117 = arith.constant 0 : index
    %88 = vector.load %arg5[%c0_116, %c0_117] : memref<9x128xf32, #tpu.memory_space<vmem>>, vector<1x128xf32>
    %89 = vector.broadcast %88 : vector<1x128xf32> to vector<128x128xf32>
    %90 = arith.mulf %87, %89 : vector<128x128xf32>
    %c0_118 = arith.constant 0 : index
    %c0_119 = arith.constant 0 : index
    %c8_120 = arith.constant 8 : index
    %c0_121 = arith.constant 0 : index
    %91 = vector.load %arg10[%c0_118, %c0_119, %c8_120, %c0_121] : memref<2x10x24x128xf32, #tpu.memory_space<vmem>>, vector<2x8x8x128xf32>
    %92 = vector.shape_cast %91 : vector<2x8x8x128xf32> to vector<128x128xf32>
    %c1_122 = arith.constant 1 : index
    %c0_123 = arith.constant 0 : index
    %93 = vector.load %arg5[%c1_122, %c0_123] : memref<9x128xf32, #tpu.memory_space<vmem>>, vector<1x128xf32>
    %94 = vector.broadcast %93 : vector<1x128xf32> to vector<128x128xf32>
    %95 = arith.mulf %92, %94 : vector<128x128xf32>
    %96 = arith.addf %90, %95 : vector<128x128xf32>
    %c0_124 = arith.constant 0 : index
    %c0_125 = arith.constant 0 : index
    %c9_126 = arith.constant 9 : index
    %c0_127 = arith.constant 0 : index
    %97 = vector.load %arg10[%c0_124, %c0_125, %c9_126, %c0_127] : memref<2x10x24x128xf32, #tpu.memory_space<vmem>>, vector<2x8x8x128xf32>
    %98 = vector.shape_cast %97 : vector<2x8x8x128xf32> to vector<128x128xf32>
    %c2_128 = arith.constant 2 : index
    %c0_129 = arith.constant 0 : index
    %99 = vector.load %arg5[%c2_128, %c0_129] : memref<9x128xf32, #tpu.memory_space<vmem>>, vector<1x128xf32>
    %100 = vector.broadcast %99 : vector<1x128xf32> to vector<128x128xf32>
    %101 = arith.mulf %98, %100 : vector<128x128xf32>
    %102 = arith.addf %96, %101 : vector<128x128xf32>
    %c0_130 = arith.constant 0 : index
    %c1_131 = arith.constant 1 : index
    %c7_132 = arith.constant 7 : index
    %c0_133 = arith.constant 0 : index
    %103 = vector.load %arg10[%c0_130, %c1_131, %c7_132, %c0_133] : memref<2x10x24x128xf32, #tpu.memory_space<vmem>>, vector<2x8x8x128xf32>
    %104 = vector.shape_cast %103 : vector<2x8x8x128xf32> to vector<128x128xf32>
    %c3_134 = arith.constant 3 : index
    %c0_135 = arith.constant 0 : index
    %105 = vector.load %arg5[%c3_134, %c0_135] : memref<9x128xf32, #tpu.memory_space<vmem>>, vector<1x128xf32>
    %106 = vector.broadcast %105 : vector<1x128xf32> to vector<128x128xf32>
    %107 = arith.mulf %104, %106 : vector<128x128xf32>
    %108 = arith.addf %102, %107 : vector<128x128xf32>
    %c0_136 = arith.constant 0 : index
    %c1_137 = arith.constant 1 : index
    %c8_138 = arith.constant 8 : index
    %c0_139 = arith.constant 0 : index
    %109 = vector.load %arg10[%c0_136, %c1_137, %c8_138, %c0_139] : memref<2x10x24x128xf32, #tpu.memory_space<vmem>>, vector<2x8x8x128xf32>
    %110 = vector.shape_cast %109 : vector<2x8x8x128xf32> to vector<128x128xf32>
    %c4_140 = arith.constant 4 : index
    %c0_141 = arith.constant 0 : index
    %111 = vector.load %arg5[%c4_140, %c0_141] : memref<9x128xf32, #tpu.memory_space<vmem>>, vector<1x128xf32>
    %112 = vector.broadcast %111 : vector<1x128xf32> to vector<128x128xf32>
    %113 = arith.mulf %110, %112 : vector<128x128xf32>
    %114 = arith.addf %108, %113 : vector<128x128xf32>
    %c0_142 = arith.constant 0 : index
    %c1_143 = arith.constant 1 : index
    %c9_144 = arith.constant 9 : index
    %c0_145 = arith.constant 0 : index
    %115 = vector.load %arg10[%c0_142, %c1_143, %c9_144, %c0_145] : memref<2x10x24x128xf32, #tpu.memory_space<vmem>>, vector<2x8x8x128xf32>
    %116 = vector.shape_cast %115 : vector<2x8x8x128xf32> to vector<128x128xf32>
    %c5_146 = arith.constant 5 : index
    %c0_147 = arith.constant 0 : index
    %117 = vector.load %arg5[%c5_146, %c0_147] : memref<9x128xf32, #tpu.memory_space<vmem>>, vector<1x128xf32>
    %118 = vector.broadcast %117 : vector<1x128xf32> to vector<128x128xf32>
    %119 = arith.mulf %116, %118 : vector<128x128xf32>
    %120 = arith.addf %114, %119 : vector<128x128xf32>
    %c0_148 = arith.constant 0 : index
    %c2_149 = arith.constant 2 : index
    %c7_150 = arith.constant 7 : index
    %c0_151 = arith.constant 0 : index
    %121 = vector.load %arg10[%c0_148, %c2_149, %c7_150, %c0_151] : memref<2x10x24x128xf32, #tpu.memory_space<vmem>>, vector<2x8x8x128xf32>
    %122 = vector.shape_cast %121 : vector<2x8x8x128xf32> to vector<128x128xf32>
    %c6_152 = arith.constant 6 : index
    %c0_153 = arith.constant 0 : index
    %123 = vector.load %arg5[%c6_152, %c0_153] : memref<9x128xf32, #tpu.memory_space<vmem>>, vector<1x128xf32>
    %124 = vector.broadcast %123 : vector<1x128xf32> to vector<128x128xf32>
    %125 = arith.mulf %122, %124 : vector<128x128xf32>
    %126 = arith.addf %120, %125 : vector<128x128xf32>
    %c0_154 = arith.constant 0 : index
    %c2_155 = arith.constant 2 : index
    %c8_156 = arith.constant 8 : index
    %c0_157 = arith.constant 0 : index
    %127 = vector.load %arg10[%c0_154, %c2_155, %c8_156, %c0_157] : memref<2x10x24x128xf32, #tpu.memory_space<vmem>>, vector<2x8x8x128xf32>
    %128 = vector.shape_cast %127 : vector<2x8x8x128xf32> to vector<128x128xf32>
    %c7_158 = arith.constant 7 : index
    %c0_159 = arith.constant 0 : index
    %129 = vector.load %arg5[%c7_158, %c0_159] : memref<9x128xf32, #tpu.memory_space<vmem>>, vector<1x128xf32>
    %130 = vector.broadcast %129 : vector<1x128xf32> to vector<128x128xf32>
    %131 = arith.mulf %128, %130 : vector<128x128xf32>
    %132 = arith.addf %126, %131 : vector<128x128xf32>
    %c0_160 = arith.constant 0 : index
    %c2_161 = arith.constant 2 : index
    %c9_162 = arith.constant 9 : index
    %c0_163 = arith.constant 0 : index
    %133 = vector.load %arg10[%c0_160, %c2_161, %c9_162, %c0_163] : memref<2x10x24x128xf32, #tpu.memory_space<vmem>>, vector<2x8x8x128xf32>
    %134 = vector.shape_cast %133 : vector<2x8x8x128xf32> to vector<128x128xf32>
    %c8_164 = arith.constant 8 : index
    %c0_165 = arith.constant 0 : index
    %135 = vector.load %arg5[%c8_164, %c0_165] : memref<9x128xf32, #tpu.memory_space<vmem>>, vector<1x128xf32>
    %136 = vector.broadcast %135 : vector<1x128xf32> to vector<128x128xf32>
    %137 = arith.mulf %134, %136 : vector<128x128xf32>
    %138 = arith.addf %132, %137 : vector<128x128xf32>
    %c0_166 = arith.constant 0 : index
    %c0_167 = arith.constant 0 : index
    %139 = vector.load %arg6[%c0_166, %c0_167] : memref<128x128xf32, #tpu.memory_space<vmem>>, vector<128x128xf32>
    %cst_168 = arith.constant dense<0.000000e+00> : vector<128x128xf32>
    %140 = tpu.matmul %138, %139, %cst_168 {dimension_numbers = #tpu.dot_dimension_numbers<[1], [0], [0], [1], [0, 0, 1, 1], [], []>} : vector<128x128xf32>, vector<128x128xf32>, vector<128x128xf32> -> vector<128x128xf32>
    %c0_169 = arith.constant 0 : index
    %c0_170 = arith.constant 0 : index
    %141 = vector.load %arg7[%c0_169, %c0_170] : memref<1x128xf32, #tpu.memory_space<vmem>>, vector<1x128xf32>
    %142 = vector.broadcast %141 : vector<1x128xf32> to vector<128x128xf32>
    %143 = arith.addf %140, %142 : vector<128x128xf32>
    %cst_171 = arith.constant 0.000000e+00 : f32
    %144 = vector.broadcast %cst_171 : f32 to vector<128x128xf32>
    %145 = arith.maximumf %143, %144 : vector<128x128xf32>
    %c0_172 = arith.constant 0 : index
    %c0_173 = arith.constant 0 : index
    %146 = vector.load %arg8[%c0_172, %c0_173] : memref<128x128xf32, #tpu.memory_space<vmem>>, vector<128x128xf32>
    tpu.vector_store %arg8[%c0_172, %c0_173], %145 {strides = array<i32>} : memref<128x128xf32, #tpu.memory_space<vmem>>, vector<128x128xf32>,
    return
  }
  func.func @transform_0(%arg0: i32) -> (i32, i32, i32, i32, i32) {
    %c0_i32 = arith.constant 0 : i32
    %c0_i32_0 = arith.constant 0 : i32
    %c0_i32_1 = arith.constant 0 : i32
    %c0_i32_2 = arith.constant 0 : i32
    %c0_i32_3 = arith.constant 0 : i32
    return %c0_i32, %arg0, %c0_i32_0, %c0_i32_1, %c0_i32_2 : i32, i32, i32, i32, i32
  }
  func.func @transform_1(%arg0: i32) -> (i32, i32) {
    %c0_i32 = arith.constant 0 : i32
    %c0_i32_0 = arith.constant 0 : i32
    %c0_i32_1 = arith.constant 0 : i32
    return %c0_i32, %c0_i32_0 : i32, i32
  }
  func.func @transform_2(%arg0: i32) -> (i32, i32) {
    %c0_i32 = arith.constant 0 : i32
    %c0_i32_0 = arith.constant 0 : i32
    %c0_i32_1 = arith.constant 0 : i32
    return %c0_i32, %c0_i32_0 : i32, i32
  }
  func.func @transform_3(%arg0: i32) -> (i32, i32) {
    %c0_i32 = arith.constant 0 : i32
    %c0_i32_0 = arith.constant 0 : i32
    %c0_i32_1 = arith.constant 0 : i32
    return %c0_i32, %c0_i32_0 : i32, i32
  }
  func.func @transform_4(%arg0: i32) -> (i32, i32) {
    %c0_i32 = arith.constant 0 : i32
    %c0_i32_0 = arith.constant 0 : i32
    %c0_i32_1 = arith.constant 0 : i32
    return %c0_i32, %c0_i32_0 : i32, i32
  }
  func.func @transform_5(%arg0: i32) -> (i32, i32) {
    %c0_i32 = arith.constant 0 : i32
    %c0_i32_0 = arith.constant 0 : i32
    %c0_i32_1 = arith.constant 0 : i32
    return %c0_i32, %c0_i32_0 : i32, i32
  }
  func.func @transform_6(%arg0: i32) -> (i32, i32) {
    %c0_i32 = arith.constant 0 : i32
    %c0_i32_0 = arith.constant 0 : i32
    %c0_i32_1 = arith.constant 0 : i32
    return %c0_i32, %c0_i32_0 : i32, i32
  }
  func.func @transform_7(%arg0: i32) -> (i32, i32) {
    %c0_i32 = arith.constant 0 : i32
    %c0_i32_0 = arith.constant 0 : i32
    return %arg0, %c0_i32 : i32, i32
  }
}

</mosaic_0001>

<bundles_post_ra>
// kernel: tpu_custom_call.1
= control target key start
LH: loop header
LB: loop body
LE: loop exit
PB: predicated region body
PF: predicated region fallthrough
CT: control target
= control target key end

     0   :  { %vm723_vm0 = vcmask 1043456   ;;  %vm142_vm1 = vcmask 31744   ;;  %v1903_v11 = vmov 0.0   ;;  %s2893_s0 = inlined_call_operand.vmem [shape: f32[4,2,8,8,4], index: 0, kind: input, shape index: {}]   ;;  %s2894_s1 = inlined_call_operand.vmem [shape: f32[9,4], index: 1, kind: input, shape index: {}]   ;;  %s2895_s2 = inlined_call_operand.vmem [shape: f32[4,128], index: 2, kind: input, shape index: {}]   ;;  %s2896_s3 = inlined_call_operand.vmem [shape: f32[1,128], index: 3, kind: input, shape index: {}]   ;;  %s2897_s4 = inlined_call_operand.vmem [shape: f32[9,128], index: 4, kind: input, shape index: {}]   ;;  %s2898_s5 = inlined_call_operand.vmem [shape: f32[128,128], index: 5, kind: input, shape index: {}]   ;;  %s2899_s6 = inlined_call_operand.vmem [shape: f32[1,128], index: 6, kind: input, shape index: {}]   ;;  %s2900_s7 = inlined_call_operand.hbm [shape: f32[128,128], index: 7, kind: output, shape index: {}]  }
   0x1   :  { %v667_v0 = vld [vmem:[%s2895_s2] sm:$0xf]  ;;  %v1958_v2 = vld [vmem:[%s2893_s0 + $0x8] sm:$0xff]  ;;  %143 = vst.msk [vmem:[#allocation2] sm:$0xff] %vm142_vm1, %v1903_v11  ;;  %144 = vst.msk [vmem:[#allocation2 + $0x8] sm:$0xff] %vm142_vm1, %v1903_v11 }
   0x2   :  { %v1953_v1 = vld [vmem:[%s2893_s0] sm:$0xff]  ;;  %1762 = vmatprep.subr.msk.mxu0 %vm723_vm0, %v667_v0  ;;  %v1968_v4 = vld [vmem:[%s2893_s0 + $0x88] sm:$0xff]  ;;  %145 = vst.msk [vmem:[#allocation2 + $0x10] sm:$0xff] %vm142_vm1, %v1903_v11  ;;  %157 = vst.msk [vmem:[#allocation2 + $0x18] sm:$0xff] %vm142_vm1, %v1903_v11 }
   0x3   :  { %v1963_v3 = vld [vmem:[%s2893_s0 + $0x80] sm:$0xff]  ;;  %1763 = vmatpush3.msk.msra.mxu0 %vm723_vm0, %v667_v0  ;;  %v61_v7 = vmax.f32 %v1958_v2, %v1968_v4  ;;  %v1982_v8 = vld [vmem:[%s2893_s0 + $0x108] sm:$0xff]  ;;  %158 = vst.msk [vmem:[#allocation2 + $0x30] sm:$0xff] %vm142_vm1, %v1903_v11  ;;  %173 = vst.msk [vmem:[#allocation2 + $0x28] sm:$0xff] %vm142_vm1, %v1903_v11 }
   0x4   :  { %v1973_v5 = vld [vmem:[%s2893_s0 + $0x100] sm:$0xff]  ;;  %v60_v6 = vmax.f32 %v1953_v1, %v1963_v3  ;;  %v1992_v10 = vld [vmem:[%s2893_s0 + $0x188] sm:$0xff]  ;;  %174 = vst.msk [vmem:[#allocation2 + $0x40] sm:$0xff] %vm142_vm1, %v1903_v11  ;;  %146 = vst.msk [vmem:[#allocation2 + $0xf0] sm:$0xff] %vm142_vm1, %v1903_v11 }
   0x5   :  { %v1987_v9 = vld [vmem:[%s2893_s0 + $0x180] sm:$0xff]  ;;  %147 = vst.msk [vmem:[#allocation2 + $0xf8] sm:$0xff] %vm142_vm1, %v1903_v11  ;;  %148 = vst.msk [vmem:[#allocation2 + $0x100] sm:$0xff] %vm142_vm1, %v1903_v11  ;;  %v111_v13 = vmax.f32 %v1982_v8, %v1992_v10  ;;  %v29_v19 = vld [vmem:[%s2893_s0 + $0x10] sm:$0xff] }
   0x6   :  { %150 = vst.msk [vmem:[#allocation2 + $0xd8] sm:$0xff] %vm142_vm1, %v1903_v11  ;;  %151 = vst.msk [vmem:[#allocation2 + $0xe0] sm:$0xff] %vm142_vm1, %v1903_v11  ;;  %v110_v12 = vmax.f32 %v1973_v5, %v1987_v9  ;;  %v2139_v16 = vld [vmem:[%s2894_s1] ss:$0 sm:$0xff]  ;;  %v2144_v17 = vld [vmem:[%s2894_s1 + $0x1] ss:$0 sm:$0xff] }
   0x7   :  { %152 = vst.msk [vmem:[#allocation2 + $0xe8] sm:$0xff] %vm142_vm1, %v1903_v11  ;;  %153 = vst.msk [vmem:[#allocation2 + $0x1c8] sm:$0xff] %vm142_vm1, %v1903_v11  ;;  %v127_v15 = vmax.f32 %v61_v7, %v111_v13  ;;  %v2149_v18 = vld [vmem:[%s2894_s1 + $0x2] ss:$0 sm:$0xff]  ;;  %v1630_v20 = vld [vmem:[%s2893_s0 + $0x90] sm:$0xff] }
   0x8   :  { %154 = vst.msk [vmem:[#allocation2 + $0x1d0] sm:$0xff] %vm142_vm1, %v1903_v11  ;;  %155 = vst.msk [vmem:[#allocation2 + $0x1d8] sm:$0xff] %vm142_vm1, %v1903_v11  ;;  %v126_v14 = vmax.f32 %v60_v6, %v110_v12  ;;  %v1646_v21 = vld [vmem:[%s2893_s0 + $0x110] sm:$0xff]  ;;  %v62_v22 = vmax.f32 %v29_v19, %v1630_v20  ;;  %v30_v24 = vld [vmem:[%s2893_s0 + $0x18] sm:$0xff] }
   0x9   :  { %159 = vst.msk [vmem:[#allocation2 + $0x48] sm:$0xff] %vm142_vm1, %v1903_v11  ;;  %160 = vst.msk [vmem:[#allocation2 + $0x60] sm:$0xff] %vm142_vm1, %v1903_v11  ;;  %v1662_v23 = vld [vmem:[%s2893_s0 + $0x190] sm:$0xff]  ;;  %v1631_v25 = vld [vmem:[%s2893_s0 + $0x98] sm:$0xff] }
   0xa   :  { %161 = vst.msk [vmem:[#allocation2 + $0x78] sm:$0xff] %vm142_vm1, %v1903_v11  ;;  %162 = vst.msk [vmem:[#allocation2 + $0x90] sm:$0xff] %vm142_vm1, %v1903_v11  ;;  %v112_v26 = vmax.f32 %v1646_v21, %v1662_v23  ;;  %v63_v27 = vmax.f32 %v30_v24, %v1631_v25  ;;  %v1647_v28 = vld [vmem:[%s2893_s0 + $0x118] sm:$0xff]  ;;  %v31_v30 = vld [vmem:[%s2893_s0 + $0x20] sm:$0xff] }
   0xb   :  { %163 = vst.msk [vmem:[#allocation2 + $0xa8] sm:$0xff] %vm142_vm1, %v1903_v11  ;;  %164 = vst.msk [vmem:[#allocation2 + $0xc0] sm:$0xff] %vm142_vm1, %v1903_v11  ;;  %v1663_v29 = vld [vmem:[%s2893_s0 + $0x198] sm:$0xff]  ;;  %v205_v31 = vld [vmem:[#allocation2 + $0x7] sm:$0xff] }
   0xc   :  { %165 = vst.msk [vmem:[#allocation2 + $0x108] sm:$0xff] %vm142_vm1, %v1903_v11  ;;  %166 = vst.msk [vmem:[#allocation2 + $0x120] sm:$0xff] %vm142_vm1, %v1903_v11  ;;  %v242_v32 = vld [vmem:[#allocation2 + $0x8] sm:$0xff]  ;;  %v113_v34 = vmax.f32 %v1647_v28, %v1663_v29  ;;  %v226_v35 = vmul.f32 %v2139_v16, %v205_v31  ;;  %v2186_v38 = vld [vmem:[%s2894_s1 + $0x3] ss:$0 sm:$0xff]  ;;  %v128_v40 = vmax.f32 %v62_v22, %v112_v26 }
   0xd   :  { %167 = vst.msk [vmem:[#allocation2 + $0x138] sm:$0xff] %vm142_vm1, %v1903_v11  ;;  %168 = vst.msk [vmem:[#allocation2 + $0x150] sm:$0xff] %vm142_vm1, %v1903_v11  ;;  %v295_v33 = vld [vmem:[#allocation2 + $0x9] sm:$0xff]  ;;  %v263_v36 = vmul.f32 %v2144_v17, %v242_v32  ;;  %v2191_v39 = vld [vmem:[%s2894_s1 + $0x4] ss:$0 sm:$0xff] }
   0xe   :  { %169 = vst.msk [vmem:[#allocation2 + $0x168] sm:$0xff] %vm142_vm1, %v1903_v11  ;;  %170 = vst.msk [vmem:[#allocation2 + $0x180] sm:$0xff] %vm142_vm1, %v1903_v11  ;;  %v316_v37 = vmul.f32 %v2149_v18, %v295_v33  ;;  %v1632_v41 = vld [vmem:[%s2893_s0 + $0xa0] sm:$0xff]  ;;  %v129_v45 = vmax.f32 %v63_v27, %v113_v34  ;;  %v32_v48 = vld [vmem:[%s2893_s0 + $0x28] sm:$0xff] }
   0xf   :  { %171 = vst.msk [vmem:[#allocation2 + $0x198] sm:$0xff] %vm142_vm1, %v1903_v11  ;;  %172 = vst.msk [vmem:[#allocation2 + $0x1b0] sm:$0xff] %vm142_vm1, %v1903_v11  ;;  %v1648_v42 = vld [vmem:[%s2893_s0 + $0x120] sm:$0xff]  ;;  %v64_v46 = vmax.f32 %v31_v30, %v1632_v41  ;;  %v1633_v49 = vld [vmem:[%s2893_s0 + $0xa8] sm:$0xff]  ;;  %v279_v51 = vadd.f32 %v263_v36, %v226_v35 }
  0x10   :  { %175 = vst.msk [vmem:[#allocation2 + $0x58] sm:$0xff] %vm142_vm1, %v1903_v11  ;;  %176 = vst.msk [vmem:[#allocation2 + $0x70] sm:$0xff] %vm142_vm1, %v1903_v11  ;;  %v1664_v43 = vld [vmem:[%s2893_s0 + $0x1a0] sm:$0xff]  ;;  %v1649_v50 = vld [vmem:[%s2893_s0 + $0x128] sm:$0xff]  ;;  %v65_v0 = vmax.f32 %v32_v48, %v1633_v49 }
  0x11   :  { %177 = vst.msk [vmem:[#allocation2 + $0x88] sm:$0xff] %vm142_vm1, %v1903_v11  ;;  %178 = vst.msk [vmem:[#allocation2 + $0xa0] sm:$0xff] %vm142_vm1, %v1903_v11  ;;  %v2205_v44 = vld [vmem:[%s2894_s1 + $0x5] ss:$0 sm:$0xff]  ;;  %v114_v47 = vmax.f32 %v1648_v42, %v1664_v43  ;;  %v2219_v52 = vld [vmem:[%s2894_s1 + $0x6] ss:$0 sm:$0xff]  ;;  %v332_v60 = vadd.f32 %v316_v37, %v279_v51 }
  0x12   :  { %179 = vst.msk [vmem:[#allocation2 + $0xb8] sm:$0xff] %vm142_vm1, %v1903_v11  ;;  %180 = vst.msk [vmem:[#allocation2 + $0xd0] sm:$0xff] %vm142_vm1, %v1903_v11  ;;  %v1665_v53 = vld [vmem:[%s2893_s0 + $0x1a8] sm:$0xff]  ;;  %v33_v54 = vld [vmem:[%s2893_s0 + $0x30] sm:$0xff] }
  0x13   :  { %181 = vst.msk [vmem:[#allocation2 + $0x118] sm:$0xff] %vm142_vm1, %v1903_v11  ;;  %182 = vst.msk [vmem:[#allocation2 + $0x130] sm:$0xff] %vm142_vm1, %v1903_v11  ;;  %v1634_v55 = vld [vmem:[%s2893_s0 + $0xb0] sm:$0xff]  ;;  %v2234_v56 = vld [vmem:[%s2894_s1 + $0x7] ss:$0 sm:$0xff]  ;;  %v130_v57 = vmax.f32 %v64_v46, %v114_v47  ;;  %v115_v1 = vmax.f32 %v1649_v50, %v1665_v53 }
  0x14   :  { %183 = vst.msk [vmem:[#allocation2 + $0x148] sm:$0xff] %vm142_vm1, %v1903_v11  ;;  %184 = vst.msk [vmem:[#allocation2 + $0x160] sm:$0xff] %vm142_vm1, %v1903_v11  ;;  %v1650_v58 = vld [vmem:[%s2893_s0 + $0x130] sm:$0xff]  ;;  %v66_v2 = vmax.f32 %v33_v54, %v1634_v55 }
  0x15   :  { %185 = vst.msk [vmem:[#allocation2 + $0x178] sm:$0xff] %vm142_vm1, %v1903_v11  ;;  %186 = vst.msk [vmem:[#allocation2 + $0x190] sm:$0xff] %vm142_vm1, %v1903_v11  ;;  %v1666_v59 = vld [vmem:[%s2893_s0 + $0x1b0] sm:$0xff]  ;;  %v131_v26 = vmax.f32 %v65_v0, %v115_v1 }
  0x16   :  { %187 = vst.msk [vmem:[#allocation2 + $0x1a8] sm:$0xff] %vm142_vm1, %v1903_v11  ;;  %188 = vst.msk [vmem:[#allocation2 + $0x1c0] sm:$0xff] %vm142_vm1, %v1903_v11  ;;  %v116_v8 = vmax.f32 %v1650_v58, %v1666_v59 }
  0x17   :  { %888 = vst [vmem:[#allocation3] sm:$0xff] %v1903_v11  ;;  %889 = vst [vmem:[#allocation3 + $0x8] sm:$0xff] %v1903_v11 }
  0x18   :  { %890 = vst [vmem:[#allocation3 + $0x10] sm:$0xff] %v1903_v11  ;;  %891 = vst [vmem:[#allocation3 + $0xf0] sm:$0xff] %v1903_v11  ;;  %v132_v27 = vmax.f32 %v66_v2, %v116_v8 }
  0x19   :  { %892 = vst [vmem:[#allocation3 + $0xf8] sm:$0xff] %v1903_v11  ;;  %893 = vst [vmem:[#allocation3 + $0x100] sm:$0xff] %v1903_v11 }
  0x1a   :  { %895 = vst [vmem:[#allocation3 + $0xd8] sm:$0xff] %v1903_v11  ;;  %896 = vst [vmem:[#allocation3 + $0xe0] sm:$0xff] %v1903_v11 }
  0x1b   :  { %897 = vst [vmem:[#allocation3 + $0xe8] sm:$0xff] %v1903_v11  ;;  %898 = vst [vmem:[#allocation3 + $0x1c8] sm:$0xff] %v1903_v11 }
  0x1c   :  { %899 = vst [vmem:[#allocation3 + $0x1d0] sm:$0xff] %v1903_v11  ;;  %900 = vst [vmem:[#allocation3 + $0x1d8] sm:$0xff] %v1903_v11 }
  0x1d   :  { %902 = vst [vmem:[#allocation3 + $0x18] sm:$0xff] %v1903_v11  ;;  %903 = vst [vmem:[#allocation3 + $0x30] sm:$0xff] %v1903_v11 }
  0x1e   :  { %904 = vst [vmem:[#allocation3 + $0x48] sm:$0xff] %v1903_v11  ;;  %905 = vst [vmem:[#allocation3 + $0x60] sm:$0xff] %v1903_v11 }
  0x1f   :  { %906 = vst [vmem:[#allocation3 + $0x78] sm:$0xff] %v1903_v11  ;;  %907 = vst [vmem:[#allocation3 + $0x90] sm:$0xff] %v1903_v11 }
  0x20   :  { %908 = vst [vmem:[#allocation3 + $0xa8] sm:$0xff] %v1903_v11  ;;  %909 = vst [vmem:[#allocation3 + $0xc0] sm:$0xff] %v1903_v11 }
  0x21   :  { %910 = vst [vmem:[#allocation3 + $0x108] sm:$0xff] %v1903_v11  ;;  %911 = vst [vmem:[#allocation3 + $0x120] sm:$0xff] %v1903_v11 }
  0x22   :  { %912 = vst [vmem:[#allocation3 + $0x138] sm:$0xff] %v1903_v11  ;;  %913 = vst [vmem:[#allocation3 + $0x150] sm:$0xff] %v1903_v11 }
  0x23   :  { %914 = vst [vmem:[#allocation3 + $0x168] sm:$0xff] %v1903_v11  ;;  %915 = vst [vmem:[#allocation3 + $0x180] sm:$0xff] %v1903_v11 }
  0x24   :  { %916 = vst [vmem:[#allocation3 + $0x198] sm:$0xff] %v1903_v11  ;;  %917 = vst [vmem:[#allocation3 + $0x1b0] sm:$0xff] %v1903_v11 }
  0x25   :  { %918 = vst [vmem:[#allocation3 + $0x28] sm:$0xff] %v1903_v11  ;;  %919 = vst [vmem:[#allocation3 + $0x40] sm:$0xff] %v1903_v11 }
  0x26   :  { %920 = vst [vmem:[#allocation3 + $0x58] sm:$0xff] %v1903_v11  ;;  %921 = vst [vmem:[#allocation3 + $0x70] sm:$0xff] %v1903_v11 }
  0x27   :  { %922 = vst [vmem:[#allocation3 + $0x88] sm:$0xff] %v1903_v11  ;;  %923 = vst [vmem:[#allocation3 + $0xa0] sm:$0xff] %v1903_v11 }
  0x28   :  { %924 = vst [vmem:[#allocation3 + $0xb8] sm:$0xff] %v1903_v11  ;;  %925 = vst [vmem:[#allocation3 + $0xd0] sm:$0xff] %v1903_v11 }
  0x29   :  { %926 = vst [vmem:[#allocation3 + $0x118] sm:$0xff] %v1903_v11  ;;  %927 = vst [vmem:[#allocation3 + $0x130] sm:$0xff] %v1903_v11 }
  0x2a   :  { %928 = vst [vmem:[#allocation3 + $0x148] sm:$0xff] %v1903_v11  ;;  %929 = vst [vmem:[#allocation3 + $0x160] sm:$0xff] %v1903_v11 }
  0x2b   :  { %930 = vst [vmem:[#allocation3 + $0x178] sm:$0xff] %v1903_v11  ;;  %931 = vst [vmem:[#allocation3 + $0x190] sm:$0xff] %v1903_v11 }
  0x2c   :  { %932 = vst [vmem:[#allocation3 + $0x1a8] sm:$0xff] %v1903_v11  ;;  %933 = vst [vmem:[#allocation3 + $0x1c0] sm:$0xff] %v1903_v11 }
  0x2d   :  { %189 = vst.msk [vmem:[#allocation2 + $0x20] sm:$0xff] %vm142_vm1, %v126_v14  ;;  %190 = vst.msk [vmem:[#allocation2 + $0x38] sm:$0xff] %vm142_vm1, %v127_v15  ;;  %v2254_v15 = vld [vmem:[%s2894_s1 + $0x8] ss:$0 sm:$0xff] }
  0x2e   :  { %191 = vst.msk [vmem:[#allocation2 + $0x50] sm:$0xff] %vm142_vm1, %v128_v40  ;;  %192 = vst.msk [vmem:[#allocation2 + $0x68] sm:$0xff] %vm142_vm1, %v129_v45 }
  0x2f   :  { %193 = vst.msk [vmem:[#allocation2 + $0x80] sm:$0xff] %vm142_vm1, %v130_v57  ;;  %194 = vst.msk [vmem:[#allocation2 + $0x98] sm:$0xff] %vm142_vm1, %v131_v26 }
  0x30   :  { %195 = vst.msk [vmem:[#allocation2 + $0xb0] sm:$0xff] %vm142_vm1, %v132_v27 }
  0x34   :  { %v348_v61 = vld [vmem:[#allocation2 + $0x1f] sm:$0xff]  ;;  %v508_v5 = vld [vmem:[#allocation2 + $0x37] sm:$0xff] }
  0x35   :  { %v401_v62 = vld [vmem:[#allocation2 + $0x20] sm:$0xff]  ;;  %v369_v3 = vmul.f32 %v2186_v38, %v348_v61  ;;  %v561_v6 = vld [vmem:[#allocation2 + $0x38] sm:$0xff]  ;;  %v227_v7 = vmul.f32 %v2139_v16, %v348_v61  ;;  %v529_v13 = vmul.f32 %v2219_v52, %v508_v5  ;;  %v370_v21 = vmul.f32 %v2186_v38, %v508_v5  ;;  %v509_v32 = vld [vmem:[#allocation2 + $0x4f] sm:$0xff] }
  0x36   :  { %v454_v63 = vld [vmem:[#allocation2 + $0x21] sm:$0xff]  ;;  %v422_v4 = vmul.f32 %v2191_v39, %v401_v62  ;;  %v614_v10 = vld [vmem:[#allocation2 + $0x39] sm:$0xff]  ;;  %v264_v11 = vmul.f32 %v2144_v17, %v401_v62  ;;  %v582_v14 = vmul.f32 %v2234_v56, %v561_v6  ;;  %v228_v22 = vmul.f32 %v2139_v16, %v508_v5  ;;  %v562_v35 = vld [vmem:[#allocation2 + $0x50] sm:$0xff] }
  0x37   :  { %v475_v9 = vmul.f32 %v2205_v44, %v454_v63  ;;  %v385_v12 = vadd.f32 %v369_v3, %v332_v60  ;;  %v317_v19 = vmul.f32 %v2149_v18, %v454_v63  ;;  %v265_v23 = vmul.f32 %v2144_v17, %v561_v6  ;;  %v615_v36 = vld [vmem:[#allocation2 + $0x51] sm:$0xff]  ;;  %v510_v49 = vld [vmem:[#allocation2 + $0x67] sm:$0xff] }
  0x38   :  { %v280_v20 = vadd.f32 %v264_v11, %v227_v7  ;;  %v318_v25 = vmul.f32 %v2149_v18, %v614_v10  ;;  %v635_v28 = vmul.f32 %v2254_v15, %v614_v10  ;;  %v423_v30 = vmul.f32 %v2191_v39, %v561_v6  ;;  %v563_v54 = vld [vmem:[#allocation2 + $0x68] sm:$0xff] }
  0x39   :  { %v438_v24 = vadd.f32 %v422_v4, %v385_v12  ;;  %v476_v31 = vmul.f32 %v2205_v44, %v614_v10  ;;  %v530_v34 = vmul.f32 %v2219_v52, %v509_v32  ;;  %v281_v37 = vadd.f32 %v265_v23, %v228_v22  ;;  %v616_v55 = vld [vmem:[#allocation2 + $0x69] sm:$0xff]  ;;  %v564_v10 = vld [vmem:[#allocation2 + $0x80] sm:$0xff] }
  0x3a   :  { %v333_v29 = vadd.f32 %v317_v19, %v280_v20  ;;  %v371_v40 = vmul.f32 %v2186_v38, %v509_v32  ;;  %v583_v42 = vmul.f32 %v2234_v56, %v562_v35  ;;  %v636_v43 = vmul.f32 %v2254_v15, %v615_v36  ;;  %v617_v11 = vld [vmem:[#allocation2 + $0x81] sm:$0xff] }
  0x3b   :  { %v491_v33 = vadd.f32 %v475_v9, %v438_v24  ;;  %v424_v45 = vmul.f32 %v2191_v39, %v562_v35  ;;  %v334_v47 = vadd.f32 %v318_v25, %v281_v37  ;;  %v477_v48 = vmul.f32 %v2205_v44, %v615_v36  ;;  %v511_v9 = vld [vmem:[#allocation2 + $0x7f] sm:$0xff] }
  0x3c   :  { %v386_v41 = vadd.f32 %v370_v21, %v333_v29  ;;  %v229_v50 = vmul.f32 %v2139_v16, %v509_v32  ;;  %v531_v53 = vmul.f32 %v2219_v52, %v510_v49  ;;  %v266_v57 = vmul.f32 %v2144_v17, %v562_v35  ;;  %v512_v29 = vld [vmem:[#allocation2 + $0x97] sm:$0xff] }
  0x3d   :  { %v545_v46 = vadd.f32 %v529_v13, %v491_v33  ;;  %v319_v58 = vmul.f32 %v2149_v18, %v615_v36  ;;  %v387_v60 = vadd.f32 %v371_v40, %v334_v47  ;;  %v584_v61 = vmul.f32 %v2234_v56, %v563_v54  ;;  %v618_v47 = vld [vmem:[#allocation2 + $0x99] sm:$0xff] }
  0x3e   :  { %v439_v51 = vadd.f32 %v423_v30, %v386_v41  ;;  %v637_v62 = vmul.f32 %v2254_v15, %v616_v55  ;;  %v282_v0 = vadd.f32 %v266_v57, %v229_v50  ;;  %v372_v1 = vmul.f32 %v2186_v38, %v510_v49  ;;  %v1651_v50 = vld [vmem:[%s2893_s0 + $0x138] sm:$0xff] }
  0x3f   :  { %v598_v59 = vadd.f32 %v582_v14, %v545_v46  ;;  %v425_v2 = vmul.f32 %v2191_v39, %v563_v54  ;;  %v440_v4 = vadd.f32 %v424_v45, %v387_v60  ;;  %v478_v5 = vmul.f32 %v2205_v44, %v616_v55 }
  0x40   :  { %v492_v63 = vadd.f32 %v476_v31, %v439_v51  ;;  %v230_v6 = vmul.f32 %v2139_v16, %v510_v49  ;;  %v335_v8 = vadd.f32 %v319_v58, %v282_v0  ;;  %v267_v12 = vmul.f32 %v2144_v17, %v563_v54  ;;  %v1667_v51 = vld [vmem:[%s2893_s0 + $0x1b8] sm:$0xff] }
  0x41   :  { %v651_v3 = vadd.f32 %v635_v28, %v598_v59  ;;  %v320_v13 = vmul.f32 %v2149_v18, %v616_v55  ;;  %v493_v14 = vadd.f32 %v477_v48, %v440_v4  ;;  %v532_v19 = vmul.f32 %v2219_v52, %v511_v9 }
  0x42   :  { %v546_v7 = vadd.f32 %v530_v34, %v492_v63  ;;  %v585_v20 = vmul.f32 %v2234_v56, %v564_v10  ;;  %v638_v21 = vmul.f32 %v2254_v15, %v617_v11  ;;  %v388_v23 = vadd.f32 %v372_v1, %v335_v8  ;;  %v565_v34 = vld [vmem:[#allocation2 + $0x98] sm:$0xff] }
  0x43   :  { %1764 = vmatprep.mubr.msk.f32.mxu0 %vm142_vm1, %v651_v3  ;;  %v283_v24 = vadd.f32 %v267_v12, %v230_v6  ;;  %v373_v25 = vmul.f32 %v2186_v38, %v511_v9  ;;  %v547_v26 = vadd.f32 %v531_v53, %v493_v14  ;;  %v426_v27 = vmul.f32 %v2191_v39, %v564_v10 }
  0x44   :  { %v599_v22 = vadd.f32 %v583_v42, %v546_v7  ;;  %v479_v28 = vmul.f32 %v2205_v44, %v617_v11  ;;  %v231_v30 = vmul.f32 %v2139_v16, %v511_v9  ;;  %v441_v32 = vadd.f32 %v425_v2, %v388_v23  ;;  %v34_v42 = vld [vmem:[%s2893_s0 + $0x38] sm:$0xff] }
  0x45   :  { %v336_v33 = vadd.f32 %v320_v13, %v283_v24  ;;  %v268_v35 = vmul.f32 %v2144_v17, %v564_v10  ;;  %v600_v36 = vadd.f32 %v584_v61, %v547_v26  ;;  %v533_v37 = vmul.f32 %v2219_v52, %v512_v29 }
  0x46   :  { %v652_v31 = vadd.f32 %v636_v43, %v599_v22  ;;  %v586_v40 = vmul.f32 %v2234_v56, %v565_v34  ;;  %v321_v41 = vmul.f32 %v2149_v18, %v617_v11  ;;  %v1635_v43 = vld [vmem:[%s2893_s0 + $0xb8] sm:$0xff]  ;;  %v494_v45 = vadd.f32 %v478_v5, %v441_v32 }
  0x47   :  { %v389_v46 = vadd.f32 %v373_v25, %v336_v33  ;;  %v284_v48 = vadd.f32 %v268_v35, %v231_v30  ;;  %v374_v49 = vmul.f32 %v2186_v38, %v512_v29  ;;  %v653_v53 = vadd.f32 %v637_v62, %v600_v36 }
  0x48   :  { %1765 = vmatmul.mubr.msk.f32.vlgmr.msra.gmra.mxu0 %vm142_vm1, %v652_v31  ;;  %v639_v54 = vmul.f32 %v2254_v15, %v618_v47  ;;  %v427_v55 = vmul.f32 %v2191_v39, %v565_v34  ;;  %v480_v57 = vmul.f32 %v2205_v44, %v618_v47 }
  0x49   :  { %12 = vsyncpa [#allocation5], 0  ;;  %v548_v58 = vadd.f32 %v532_v19, %v494_v45  ;;  %v442_v59 = vadd.f32 %v426_v27, %v389_v46  ;;  %v337_v60 = vadd.f32 %v321_v41, %v284_v48  ;;  %v67_v61 = vmax.f32 %v34_v42, %v1635_v43  ;;  %1767 = vmatprep.mubr.msk.f32.mxu0 %vm142_vm1, %v653_v53  ;;  %v513_v63 = vld [vmem:[#allocation2 + $0xaf] sm:$0xff]  ;;  %v35_v13 = vld [vmem:[%s2893_s0 + $0x40] sm:$0xff] }
  0x4a   :  { %v117_v0 = vmax.f32 %v1651_v50, %v1667_v51  ;;  %v232_v1 = vmul.f32 %v2139_v16, %v512_v29  ;;  %v269_v2 = vmul.f32 %v2144_v17, %v565_v34  ;;  %v322_v62 = vmul.f32 %v2149_v18, %v618_v47  ;;  %v566_v7 = vld [vmem:[#allocation2 + $0xb0] sm:$0xff]  ;;  %v36_v14 = vld [vmem:[%s2893_s0 + $0x48] sm:$0xff]  ;;  %v1636_v24 = vld [vmem:[%s2893_s0 + $0xc0] sm:$0xff] }
  0x4b   :  { %v601_v3 = vadd.f32 %v585_v20, %v548_v58  ;;  %v495_v4 = vadd.f32 %v479_v28, %v442_v59  ;;  %v390_v5 = vadd.f32 %v374_v49, %v337_v60  ;;  %v534_v6 = vmul.f32 %v2219_v52, %v513_v63  ;;  %v619_v9 = vld [vmem:[#allocation2 + $0xb1] sm:$0xff]  ;;  %v1637_v25 = vld [vmem:[%s2893_s0 + $0xc8] sm:$0xff]  ;;  %v1652_v26 = vld [vmem:[%s2893_s0 + $0x140] sm:$0xff] }
  0x4c   :  { %v587_v8 = vmul.f32 %v2234_v56, %v566_v7  ;;  %v133_v10 = vmax.f32 %v67_v61, %v117_v0  ;;  %v285_v11 = vadd.f32 %v269_v2, %v232_v1  ;;  %v375_v12 = vmul.f32 %v2186_v38, %v513_v63  ;;  %v1653_v30 = vld [vmem:[%s2893_s0 + $0x148] sm:$0xff]  ;;  %v1668_v31 = vld [vmem:[%s2893_s0 + $0x1c0] sm:$0xff]  ;;  %v250_v41 = vld [vmem:[#allocation2 + $0xf8] sm:$0xff] }
  0x4d   :  { %v654_v19 = vadd.f32 %v638_v21, %v601_v3  ;;  %v549_v20 = vadd.f32 %v533_v37, %v495_v4  ;;  %v443_v22 = vadd.f32 %v427_v55, %v390_v5  ;;  %v233_v23 = vmul.f32 %v2139_v16, %v513_v63  ;;  %v1669_v32 = vld [vmem:[%s2893_s0 + $0x1c8] sm:$0xff]  ;;  %v213_v37 = vld [vmem:[#allocation2 + $0xf7] sm:$0xff]  ;;  %v39_v1 = vld [vmem:[%s2893_s0 + $0x60] sm:$0xff] }
  0x4e   :  { %v640_v27 = vmul.f32 %v2254_v15, %v619_v9  ;;  %196 = vst.msk [vmem:[#allocation2 + $0xc8] sm:$0xff] %vm142_vm1, %v133_v10  ;;  %v338_v21 = vadd.f32 %v322_v62, %v285_v11  ;;  %v428_v28 = vmul.f32 %v2191_v39, %v566_v7  ;;  %v270_v29 = vmul.f32 %v2144_v17, %v566_v7  ;;  %v303_v42 = vld [vmem:[#allocation2 + $0xf9] sm:$0xff]  ;;  %v37_v48 = vld [vmem:[%s2893_s0 + $0x50] sm:$0xff] }
  0x4f   :  { %1768 = vmatmul.mubr.msk.f32.gmra.mxu0 %vm142_vm1, %v654_v19  ;;  %v602_v33 = vadd.f32 %v586_v40, %v549_v20  ;;  %v496_v34 = vadd.f32 %v480_v57, %v443_v22  ;;  %v481_v35 = vmul.f32 %v2205_v44, %v619_v9  ;;  %v323_v36 = vmul.f32 %v2149_v18, %v619_v9  ;;  %v1638_v40 = vld [vmem:[%s2893_s0 + $0xd0] sm:$0xff]  ;;  %v38_v58 = vld [vmem:[%s2893_s0 + $0x58] sm:$0xff]  ;;  %v1640_v5 = vld [vmem:[%s2893_s0 + $0xe0] sm:$0xff] }
  0x50   :  { %v391_v43 = vadd.f32 %v375_v12, %v338_v21  ;;  %v286_v45 = vadd.f32 %v270_v29, %v233_v23  ;;  %v68_v46 = vmax.f32 %v35_v13, %v1636_v24  ;;  %v69_v47 = vmax.f32 %v36_v14, %v1637_v25  ;;  %v1654_v49 = vld [vmem:[%s2893_s0 + $0x150] sm:$0xff]  ;;  %v1639_v59 = vld [vmem:[%s2893_s0 + $0xd8] sm:$0xff]  ;;  %v1672_v7 = vld [vmem:[%s2893_s0 + $0x1e0] sm:$0xff] }
  0x51   :  { %v655_v50 = vadd.f32 %v639_v54, %v602_v33  ;;  %v550_v51 = vadd.f32 %v534_v6, %v496_v34  ;;  %v118_v53 = vmax.f32 %v1652_v26, %v1668_v31  ;;  %v119_v55 = vmax.f32 %v1653_v30, %v1669_v32  ;;  %v1670_v57 = vld [vmem:[%s2893_s0 + $0x1d0] sm:$0xff]  ;;  %v1655_v63 = vld [vmem:[%s2893_s0 + $0x158] sm:$0xff]  ;;  %v1656_v6 = vld [vmem:[%s2893_s0 + $0x160] sm:$0xff] }
  0x52   :  { %v444_v60 = vadd.f32 %v428_v28, %v391_v43  ;;  %v234_v61 = vmul.f32 %v2139_v16, %v213_v37  ;;  %v271_v54 = vmul.f32 %v2144_v17, %v250_v41  ;;  %v1671_v0 = vld [vmem:[%s2893_s0 + $0x1d8] sm:$0xff]  ;;  %v339_v62 = vadd.f32 %v323_v36, %v286_v45  ;;  %v40_v12 = vld [vmem:[%s2893_s0 + $0x68] sm:$0xff]  ;;  %v41_v20 = vld [vmem:[%s2893_s0 + $0x70] sm:$0xff] }
  0x53   :  { %1770 = vmatprep.mubr.msk.f32.mxu0 %vm142_vm1, %v655_v50  ;;  %v603_v2 = vadd.f32 %v587_v8, %v550_v51  ;;  %v134_v3 = vmax.f32 %v68_v46, %v118_v53  ;;  %v135_v4 = vmax.f32 %v69_v47, %v119_v55  ;;  %v324_v10 = vmul.f32 %v2149_v18, %v303_v42  ;;  %v1641_v13 = vld [vmem:[%s2893_s0 + $0xe8] sm:$0xff]  ;;  %v1658_v33 = vld [vmem:[%s2893_s0 + $0x170] sm:$0xff]  ;;  %v515_v41 = vld [vmem:[#allocation2 + $0xdf] sm:$0xff] }
  0x54   :  { %v497_v9 = vadd.f32 %v481_v35, %v444_v60  ;;  %v70_v11 = vmax.f32 %v37_v48, %v1638_v40  ;;  %v120_v8 = vmax.f32 %v1654_v49, %v1670_v57  ;;  %v1657_v14 = vld [vmem:[%s2893_s0 + $0x168] sm:$0xff]  ;;  %v287_v26 = vadd.f32 %v271_v54, %v234_v61  ;;  %v1674_v34 = vld [vmem:[%s2893_s0 + $0x1f0] sm:$0xff]  ;;  %v568_v48 = vld [vmem:[#allocation2 + $0xe0] sm:$0xff] }
  0x55   :  { %v1673_v19 = vld [vmem:[%s2893_s0 + $0x1e8] sm:$0xff]  ;;  %v656_v22 = vadd.f32 %v640_v27, %v603_v2  ;;  %197 = vst.msk [vmem:[#allocation2 + $0x110] sm:$0xff] %vm142_vm1, %v134_v3  ;;  %198 = vst.msk [vmem:[#allocation2 + $0x128] sm:$0xff] %vm142_vm1, %v135_v4  ;;  %v71_v21 = vmax.f32 %v38_v58, %v1639_v59  ;;  %v121_v28 = vmax.f32 %v1655_v63, %v1671_v0  ;;  %v1642_v27 = vld [vmem:[%s2893_s0 + $0xf0] sm:$0xff] }
  0x56   :  { %v514_v23 = vld [vmem:[#allocation2 + $0xc7] sm:$0xff]  ;;  %v72_v32 = vmax.f32 %v39_v1, %v1640_v5  ;;  %v136_v42 = vmax.f32 %v70_v11, %v120_v8  ;;  %v122_v47 = vmax.f32 %v1656_v6, %v1672_v7  ;;  %v73_v40 = vmax.f32 %v40_v12, %v1641_v13  ;;  %v2431_v60 = vld [vmem:[%s2893_s0 + $0x78] sm:$0xff] }
  0x57   :  { %v567_v24 = vld [vmem:[#allocation2 + $0xc8] sm:$0xff]  ;;  %v535_v29 = vmul.f32 %v2219_v52, %v514_v23  ;;  %v376_v31 = vmul.f32 %v2186_v38, %v514_v23  ;;  %1771 = vmatmul.mubr.msk.f32.gmra.mxu0 %vm142_vm1, %v656_v22  ;;  %v137_v46 = vmax.f32 %v71_v21, %v121_v28  ;;  %v123_v49 = vmax.f32 %v1657_v14, %v1673_v19  ;;  %v2436_v0 = vld [vmem:[%s2893_s0 + $0xf8] sm:$0xff] }
  0x58   :  { %v620_v25 = vld [vmem:[#allocation2 + $0xc9] sm:$0xff]  ;;  %v588_v30 = vmul.f32 %v2234_v56, %v567_v24  ;;  %v429_v36 = vmul.f32 %v2191_v39, %v567_v24  ;;  %199 = vst.msk [vmem:[#allocation2 + $0x140] sm:$0xff] %vm142_vm1, %v136_v42  ;;  %v74_v50 = vmax.f32 %v41_v20, %v1642_v27  ;;  %v124_v51 = vmax.f32 %v1658_v33, %v1674_v34  ;;  %v621_v58 = vld [vmem:[#allocation2 + $0xe1] sm:$0xff]  ;;  %v2441_v1 = vld [vmem:[%s2893_s0 + $0x178] sm:$0xff] }
  0x59   :  { %v641_v35 = vmul.f32 %v2254_v15, %v620_v25  ;;  %v482_v37 = vmul.f32 %v2205_v44, %v620_v25  ;;  %v551_v43 = vadd.f32 %v535_v29, %v497_v9  ;;  %v392_v45 = vadd.f32 %v376_v31, %v339_v62  ;;  %200 = vst.msk [vmem:[#allocation2 + $0x158] sm:$0xff] %vm142_vm1, %v137_v46  ;;  %v2446_v2 = vld [vmem:[%s2893_s0 + $0x1f8] sm:$0xff] }
  0x5a   :  { %v536_v57 = vmul.f32 %v2219_v52, %v515_v41  ;;  %v138_v59 = vmax.f32 %v72_v32, %v122_v47  ;;  %v340_v61 = vadd.f32 %v324_v10, %v287_v26  ;;  %v139_v54 = vmax.f32 %v73_v40, %v123_v49 }
  0x5b   :  { %v604_v53 = vadd.f32 %v588_v30, %v551_v43  ;;  %v445_v55 = vadd.f32 %v429_v36, %v392_v45  ;;  %v140_v63 = vmax.f32 %v74_v50, %v124_v51  ;;  %v589_v4 = vmul.f32 %v2234_v56, %v568_v48 }
  0x5c   :  { %v356_v5 = vld [vmem:[#allocation2 + $0x10f] sm:$0xff]  ;;  %201 = vst.msk [vmem:[#allocation2 + $0x170] sm:$0xff] %vm142_vm1, %v138_v59  ;;  %v516_v11 = vld [vmem:[#allocation2 + $0x127] sm:$0xff]  ;;  %202 = vst.msk [vmem:[#allocation2 + $0x188] sm:$0xff] %vm142_vm1, %v139_v54  ;;  %v642_v13 = vmul.f32 %v2254_v15, %v621_v58  ;;  %v75_v14 = vmax.f32 %v2431_v60, %v2436_v0  ;;  %v125_v19 = vmax.f32 %v2441_v1, %v2446_v2 }
  0x5d   :  { %v657_v62 = vadd.f32 %v641_v35, %v604_v53  ;;  %v498_v3 = vadd.f32 %v482_v37, %v445_v55  ;;  %v409_v6 = vld [vmem:[#allocation2 + $0x110] sm:$0xff]  ;;  %v377_v9 = vmul.f32 %v2186_v38, %v356_v5  ;;  %v235_v8 = vmul.f32 %v2139_v16, %v356_v5  ;;  %203 = vst.msk [vmem:[#allocation2 + $0x1a0] sm:$0xff] %vm142_vm1, %v140_v63  ;;  %v569_v23 = vld [vmem:[#allocation2 + $0x128] sm:$0xff] }
  0x5e   :  { %v462_v7 = vld [vmem:[#allocation2 + $0x111] sm:$0xff]  ;;  %v430_v10 = vmul.f32 %v2191_v39, %v409_v6  ;;  %v622_v24 = vld [vmem:[#allocation2 + $0x129] sm:$0xff]  ;;  %v272_v25 = vmul.f32 %v2144_v17, %v409_v6  ;;  %v537_v28 = vmul.f32 %v2219_v52, %v516_v11  ;;  %v590_v29 = vmul.f32 %v2234_v56, %v569_v23 }
  0x5f   :  { %1773 = vmatprep.mubr.msk.f32.mxu0 %vm142_vm1, %v657_v62  ;;  %v552_v12 = vadd.f32 %v536_v57, %v498_v3  ;;  %v393_v20 = vadd.f32 %v377_v9, %v340_v61  ;;  %v483_v22 = vmul.f32 %v2205_v44, %v462_v7  ;;  %v325_v26 = vmul.f32 %v2149_v18, %v462_v7  ;;  %v517_v36 = vld [vmem:[#allocation2 + $0x13f] sm:$0xff] }
  0x60   :  { %v236_v30 = vmul.f32 %v2139_v16, %v516_v11  ;;  %v643_v32 = vmul.f32 %v2254_v15, %v622_v24  ;;  %v288_v27 = vadd.f32 %v272_v25, %v235_v8  ;;  %v378_v33 = vmul.f32 %v2186_v38, %v516_v11  ;;  %v570_v47 = vld [vmem:[#allocation2 + $0x140] sm:$0xff]  ;;  %v518_v58 = vld [vmem:[#allocation2 + $0x157] sm:$0xff] }
  0x61   :  { %v605_v21 = vadd.f32 %v589_v4, %v552_v12  ;;  %v446_v31 = vadd.f32 %v430_v10, %v393_v20  ;;  %v431_v35 = vmul.f32 %v2191_v39, %v569_v23  ;;  %v273_v37 = vmul.f32 %v2144_v17, %v569_v23  ;;  %v623_v48 = vld [vmem:[#allocation2 + $0x141] sm:$0xff]  ;;  %v571_v63 = vld [vmem:[#allocation2 + $0x158] sm:$0xff] }
  0x62   :  { %v326_v41 = vmul.f32 %v2149_v18, %v622_v24  ;;  %v341_v43 = vadd.f32 %v325_v26, %v288_v27  ;;  %v484_v45 = vmul.f32 %v2205_v44, %v622_v24  ;;  %v538_v46 = vmul.f32 %v2219_v52, %v517_v36  ;;  %v624_v9 = vld [vmem:[#allocation2 + $0x159] sm:$0xff] }
  0x63   :  { %v658_v34 = vadd.f32 %v642_v13, %v605_v21  ;;  %v499_v42 = vadd.f32 %v483_v22, %v446_v31  ;;  %v591_v40 = vmul.f32 %v2234_v56, %v570_v47  ;;  %v644_v49 = vmul.f32 %v2254_v15, %v623_v48  ;;  %v519_v26 = vld [vmem:[#allocation2 + $0x16f] sm:$0xff] }
  0x64   :  { %v289_v50 = vadd.f32 %v273_v37, %v236_v30  ;;  %v379_v51 = vmul.f32 %v2186_v38, %v517_v36  ;;  %v394_v55 = vadd.f32 %v378_v33, %v341_v43  ;;  %v432_v57 = vmul.f32 %v2191_v39, %v570_v47  ;;  %v572_v21 = vld [vmem:[#allocation2 + $0x170] sm:$0xff]  ;;  %v627_v1 = vld [vmem:[#allocation2 + $0x1a1] sm:$0xff] }
  0x65   :  { %1774 = vmatmul.mubr.msk.f32.gmra.mxu0 %vm142_vm1, %v658_v34  ;;  %v553_v53 = vadd.f32 %v537_v28, %v499_v42  ;;  %v237_v59 = vmul.f32 %v2139_v16, %v517_v36  ;;  %v485_v54 = vmul.f32 %v2205_v44, %v623_v48  ;;  %v274_v62 = vmul.f32 %v2144_v17, %v570_v47 }
  0x66   :  { %v342_v61 = vadd.f32 %v326_v41, %v289_v50  ;;  %v327_v3 = vmul.f32 %v2149_v18, %v623_v48  ;;  %v447_v5 = vadd.f32 %v431_v35, %v394_v55  ;;  %v539_v6 = vmul.f32 %v2219_v52, %v518_v58  ;;  %v625_v35 = vld [vmem:[#allocation2 + $0x171] sm:$0xff]  ;;  %v520_v41 = vld [vmem:[#allocation2 + $0x187] sm:$0xff] }
  0x67   :  { %v606_v4 = vadd.f32 %v590_v29, %v553_v53  ;;  %v592_v7 = vmul.f32 %v2234_v56, %v571_v63  ;;  %v645_v11 = vmul.f32 %v2254_v15, %v624_v9  ;;  %v290_v8 = vadd.f32 %v274_v62, %v237_v59 }
  0x68   :  { %v395_v10 = vadd.f32 %v379_v51, %v342_v61  ;;  %v380_v12 = vmul.f32 %v2186_v38, %v518_v58  ;;  %v500_v20 = vadd.f32 %v484_v45, %v447_v5  ;;  %v433_v22 = vmul.f32 %v2191_v39, %v571_v63 }
  0x69   :  { %v659_v13 = vadd.f32 %v643_v32, %v606_v4  ;;  %v238_v23 = vmul.f32 %v2139_v16, %v518_v58  ;;  %v343_v25 = vadd.f32 %v327_v3, %v290_v8  ;;  %v275_v28 = vmul.f32 %v2144_v17, %v571_v63  ;;  %v626_v63 = vld [vmem:[#allocation2 + $0x189] sm:$0xff] }
  0x6a   :  { %v448_v24 = vadd.f32 %v432_v57, %v395_v10  ;;  %v328_v29 = vmul.f32 %v2149_v18, %v624_v9  ;;  %v554_v30 = vadd.f32 %v538_v46, %v500_v20  ;;  %v486_v31 = vmul.f32 %v2205_v44, %v624_v9 }
  0x6b   :  { %1776 = vmatprep.mubr.msk.f32.mxu0 %vm142_vm1, %v659_v13  ;;  %v540_v32 = vmul.f32 %v2219_v52, %v519_v26  ;;  %v593_v27 = vmul.f32 %v2234_v56, %v572_v21  ;;  %v396_v34 = vadd.f32 %v380_v12, %v343_v25  ;;  %v291_v36 = vadd.f32 %v275_v28, %v238_v23  ;;  %v574_v12 = vld [vmem:[#allocation2 + $0x1a0] sm:$0xff] }
  0x6c   :  { %v501_v33 = vadd.f32 %v485_v54, %v448_v24  ;;  %v381_v37 = vmul.f32 %v2186_v38, %v519_v26  ;;  %v607_v42 = vadd.f32 %v591_v40, %v554_v30  ;;  %v646_v43 = vmul.f32 %v2254_v15, %v625_v35  ;;  %v573_v54 = vld [vmem:[#allocation2 + $0x188] sm:$0xff] }
  0x6d   :  { %v434_v45 = vmul.f32 %v2191_v39, %v572_v21  ;;  %v239_v46 = vmul.f32 %v2139_v16, %v519_v26  ;;  %v449_v48 = vadd.f32 %v433_v22, %v396_v34  ;;  %v344_v50 = vadd.f32 %v328_v29, %v291_v36 }
  0x6e   :  { %v555_v47 = vadd.f32 %v539_v6, %v501_v33  ;;  %v276_v51 = vmul.f32 %v2144_v17, %v572_v21  ;;  %v660_v53 = vadd.f32 %v644_v49, %v607_v42  ;;  %v487_v55 = vmul.f32 %v2205_v44, %v625_v35 }
  0x6f   :  { %v329_v57 = vmul.f32 %v2149_v18, %v625_v35  ;;  %v382_v58 = vmul.f32 %v2186_v38, %v520_v41  ;;  %v502_v40 = vadd.f32 %v486_v31, %v449_v48  ;;  %v397_v61 = vadd.f32 %v381_v37, %v344_v50 }
  0x70   :  { %v608_v59 = vadd.f32 %v592_v7, %v555_v47  ;;  %v292_v62 = vadd.f32 %v276_v51, %v239_v46  ;;  %1777 = vmatmul.mubr.msk.f32.gmra.mxu0 %vm142_vm1, %v660_v53  ;;  %v541_v3 = vmul.f32 %v2219_v52, %v520_v41  ;;  %v594_v4 = vmul.f32 %v2234_v56, %v573_v54  ;;  %v521_v7 = vld [vmem:[#allocation2 + $0x19f] sm:$0xff] }
  0x71   :  { %v647_v49 = vmul.f32 %v2254_v15, %v626_v63  ;;  %v435_v5 = vmul.f32 %v2191_v39, %v573_v54  ;;  %v556_v9 = vadd.f32 %v540_v32, %v502_v40  ;;  %v450_v10 = vadd.f32 %v434_v45, %v397_v61  ;;  %v523_v40 = vld [vmem:[#allocation2 + $0x1cf] sm:$0xff] }
  0x72   :  { %v661_v6 = vadd.f32 %v645_v11, %v608_v59  ;;  %v345_v8 = vadd.f32 %v329_v57, %v292_v62  ;;  %v141_v13 = vmax.f32 %v75_v14, %v125_v19  ;;  %v240_v20 = vmul.f32 %v2139_v16, %v520_v41  ;;  %v576_v62 = vld [vmem:[#allocation2 + $0x1d0] sm:$0xff] }
  0x73   :  { %v277_v22 = vmul.f32 %v2144_v17, %v573_v54  ;;  %v330_v23 = vmul.f32 %v2149_v18, %v626_v63  ;;  %v609_v11 = vadd.f32 %v593_v27, %v556_v9  ;;  %v503_v24 = vadd.f32 %v487_v55, %v450_v10 }
  0x74   :  { %1779 = vmatprep.mubr.msk.f32.mxu0 %vm142_vm1, %v661_v6  ;;  %v398_v25 = vadd.f32 %v382_v58, %v345_v8  ;;  %v488_v26 = vmul.f32 %v2205_v44, %v626_v63  ;;  %v542_v21 = vmul.f32 %v2219_v52, %v521_v7  ;;  %204 = vst.msk [vmem:[#allocation2 + $0x1b8] sm:$0xff] %vm142_vm1, %v141_v13  ;;  %v1421_v13 = vld [vmem:[%s2898_s5 + $0x48] sm:$0xff] }
  0x75   :  { %v293_v60 = vadd.f32 %v277_v22, %v240_v20  ;;  %v383_v0 = vmul.f32 %v2186_v38, %v521_v7  ;;  %v241_v2 = vmul.f32 %v2139_v16, %v521_v7  ;;  %v662_v14 = vadd.f32 %v646_v43, %v609_v11  ;;  %v1423_v7 = vld [vmem:[%s2898_s5 + $0x58] sm:$0xff]  ;;  %v1420_v20 = vld [vmem:[%s2898_s5 + $0x40] sm:$0xff]  ;;  %v1417_v11 = vld [vmem:[%s2898_s5 + $0x28] sm:$0xff] }
  0x76   :  { %v557_v19 = vadd.f32 %v541_v3, %v503_v24  ;;  %v451_v28 = vadd.f32 %v435_v5, %v398_v25  ;;  %v278_v29 = vmul.f32 %v2144_v17, %v574_v12  ;;  %v595_v30 = vmul.f32 %v2234_v56, %v574_v12  ;;  %v629_v5 = vld [vmem:[#allocation2 + $0x1d1] sm:$0xff]  ;;  %v1416_v24 = vld [vmem:[%s2898_s5 + $0x20] sm:$0xff] }
  0x77   :  { %v346_v31 = vadd.f32 %v330_v23, %v293_v60  ;;  %v436_v32 = vmul.f32 %v2191_v39, %v574_v12  ;;  %1780 = vmatmul.mubr.msk.f32.gmra.mxu0 %vm142_vm1, %v662_v14  ;;  %v331_v35 = vmul.f32 %v2149_v18, %v627_v1  ;;  %v489_v16 = vmul.f32 %v2205_v44, %v627_v1  ;;  %v1422_v12 = vld [vmem:[%s2898_s5 + $0x50] sm:$0xff]  ;;  %v1419_v22 = vld [vmem:[%s2898_s5 + $0x38] sm:$0xff]  ;;  %v2594_v60 = vld [vmem:[%s2896_s3] ss:$0 sm:$0xff] }
  0x78   :  { %v610_v27 = vadd.f32 %v594_v4, %v557_v19  ;;  %v504_v33 = vadd.f32 %v488_v26, %v451_v28  ;;  %v294_v34 = vadd.f32 %v278_v29, %v241_v2  ;;  %v648_v42 = vmul.f32 %v2254_v15, %v627_v1  ;;  %v1418_v23 = vld [vmem:[%s2898_s5 + $0x30] sm:$0xff]  ;;  %v1415_v25 = vld [vmem:[%s2898_s5 + $0x18] sm:$0xff]  ;;  %v1412_v1 = vld [vmem:[%s2898_s5] sm:$0xff] }
  0x79   :  { %v399_v36 = vadd.f32 %v383_v0, %v346_v31  ;;  %v544_v4 = vmul.f32 %v2219_v52, %v523_v40  ;;  %v650_v9 = vmul.f32 %v2254_v15, %v629_v5  ;;  %v1414_v26 = vld [vmem:[%s2898_s5 + $0x10] sm:$0xff]  ;;  %v950_v19 = vld [vmem:[#allocation3 + $0x7] sm:$0xff]  ;;  %v2600_v28 = vld [vmem:[%s2897_s4] ss:$0 sm:$0xff] }
  0x7a   :  { %v663_v37 = vadd.f32 %v647_v49, %v610_v27  ;;  %v558_v41 = vadd.f32 %v542_v21, %v504_v33  ;;  %v347_v47 = vadd.f32 %v331_v35, %v294_v34  ;;  %v1413_v21 = vld [vmem:[%s2898_s5 + $0x8] sm:$0xff]  ;;  %v2606_v31 = vld [vmem:[%s2897_s4 + $0x1] ss:$0 sm:$0xff]  ;;  %v971_v27 = vmul.f32 %v2600_v28, %v950_v19 }
  0x7b   :  { %v452_v17 = vadd.f32 %v436_v32, %v399_v36  ;;  %v522_v45 = vld [vmem:[#allocation2 + $0x1b7] sm:$0xff]  ;;  %v2609_v33 = vld [vmem:[#allocation3] sm:$0xff]  ;;  %v1040_v35 = vld [vmem:[#allocation3 + $0x9] sm:$0xff] }
  0x7c   :  { %1782 = vmatprep.mubr.msk.f32.mxu0 %vm142_vm1, %v663_v37  ;;  %v611_v43 = vadd.f32 %v595_v30, %v558_v41  ;;  %v575_v46 = vld [vmem:[#allocation2 + $0x1b8] sm:$0xff]  ;;  %v543_v50 = vmul.f32 %v2219_v52, %v522_v45  ;;  %v384_v55 = vmul.f32 %v2186_v38, %v522_v45  ;;  %v597_v38 = vmul.f32 %v2234_v56, %v576_v62  ;;  %v1426_v52 = vld [vmem:[%s2898_s5 + $0x70] sm:$0xff]  ;;  %v2618_v36 = vld [vmem:[%s2897_s4 + $0x2] ss:$0 sm:$0xff] }
  0x7d   :  { %v505_v48 = vadd.f32 %v489_v16, %v452_v17  ;;  %v596_v51 = vmul.f32 %v2234_v56, %v575_v46  ;;  %v628_v18 = vld [vmem:[#allocation2 + $0x1b9] sm:$0xff]  ;;  %v437_v57 = vmul.f32 %v2191_v39, %v575_v46  ;;  %v1425_v56 = vld [vmem:[%s2898_s5 + $0x68] sm:$0xff]  ;;  %v2613_v34 = vmul.f32 %v2609_v33, %v2606_v31  ;;  %v2646_v62 = vld [vmem:[%s2897_s4 + $0x5] ss:$0 sm:$0xff] }
  0x7e   :  { %v664_v53 = vadd.f32 %v648_v42, %v611_v43  ;;  %v649_v59 = vmul.f32 %v2254_v15, %v628_v18  ;;  %v400_v61 = vadd.f32 %v384_v55, %v347_v47  ;;  %v490_v54 = vmul.f32 %v2205_v44, %v628_v18  ;;  %v1427_v44 = vld [vmem:[%s2898_s5 + $0x78] sm:$0xff]  ;;  %v1424_v15 = vld [vmem:[%s2898_s5 + $0x60] sm:$0xff] }
  0x7f   :  { %v559_v58 = vadd.f32 %v543_v50, %v505_v48  ;;  %1788 = vmatprep.subr.mxu0 %v1427_v44  ;;  %1844 = vmatprep.subr.mxu1 %v1427_v44  ;;  %v1024_v41 = vadd.f32 %v2613_v34, %v971_v27  ;;  %v1061_v42 = vmul.f32 %v2618_v36, %v1040_v35  ;;  %v2636_v55 = vld [vmem:[%s2897_s4 + $0x4] ss:$0 sm:$0xff] }
  0x80   :  { %1783 = vmatmul.mubr.msk.f32.gmra.mxu0 %vm142_vm1, %v664_v53  ;;  %v453_v3 = vadd.f32 %v437_v57, %v400_v61  ;;  %1860 = vmatpush3.msra.mxu1 %v1427_v44 }
  0x81   :  { %v612_v63 = vadd.f32 %v596_v51, %v559_v58  ;;  %1789 = vmatpush3.msra.mxu0 %v1427_v44  ;;  %1845 = vmatprep.subr.mxu1 %v1426_v52  ;;  %v1077_v47 = vadd.f32 %v1061_v42, %v1024_v41  ;;  %v2630_v51 = vld [vmem:[%s2897_s4 + $0x3] ss:$0 sm:$0xff] }
  0x82   :  { %v506_v6 = vadd.f32 %v490_v54, %v453_v3  ;;  %1790 = vmatprep.subr.mxu0 %v1426_v52  ;;  %1861 = vmatpush3.msra.mxu1 %v1426_v52  ;;  %v2651_v3 = vld [vmem:[%s2897_s4 + $0x7] ss:$0 sm:$0xff] }
  0x83   :  { %v665_v49 = vadd.f32 %v649_v59, %v612_v63  ;;  %1791 = vmatpush3.msra.mxu0 %v1426_v52  ;;  %1846 = vmatprep.subr.mxu1 %v1425_v56 }
  0x84   :  { %v560_v39 = vadd.f32 %v544_v4, %v506_v6  ;;  %1792 = vmatprep.subr.mxu0 %v1425_v56  ;;  %1862 = vmatpush3.msra.mxu1 %v1425_v56 }
  0x85   :  { %1785 = vmatprep.mubr.msk.f32.mxu0 %vm142_vm1, %v665_v49  ;;  %1793 = vmatpush3.msra.mxu0 %v1425_v56  ;;  %v2668_v56 = vld [vmem:[%s2897_s4 + $0x8] ss:$0 sm:$0xff] }
  0x86   :  { %v613_v10 = vadd.f32 %v597_v38, %v560_v39  ;;  %1794 = vmatprep.subr.mxu0 %v1424_v15  ;;  %1847 = vmatprep.subr.mxu1 %v1424_v15  ;;  %v2658_v38 = vld [vmem:[%s2897_s4 + $0x6] ss:$0 sm:$0xff] }
  0x87   :  { %1795 = vmatpush3.msra.mxu0 %v1424_v15  ;;  %1863 = vmatpush3.msra.mxu1 %v1424_v15 }
  0x88   :  { %v666_v8 = vadd.f32 %v650_v9, %v613_v10  ;;  %1796 = vmatprep.subr.mxu0 %v1423_v7  ;;  %1848 = vmatprep.subr.mxu1 %v1423_v7 }
  0x89   :  { %1797 = vmatpush3.msra.mxu0 %v1423_v7  ;;  %1864 = vmatpush3.msra.mxu1 %v1423_v7 }
  0x8a   :  { %1786 = vmatmul.mubr.msk.f32.gmra.mxu0 %vm142_vm1, %v666_v8  ;;  %1798 = vmatprep.subr.mxu0 %v1422_v12 }
  0x8b   :  { %1849 = vmatprep.subr.mxu1 %v1422_v12  ;;  %1799 = vmatpush3.msra.mxu0 %v1422_v12 }
  0x8c   :  { %1865 = vmatpush3.msra.mxu1 %v1422_v12  ;;  %1800 = vmatprep.subr.mxu0 %v1421_v13 }
  0x8d   :  { %1850 = vmatprep.subr.mxu1 %v1421_v13  ;;  %1801 = vmatpush3.msra.mxu0 %v1421_v13 }
  0x8e   :  { %1866 = vmatpush3.msra.mxu1 %v1421_v13  ;;  %1802 = vmatprep.subr.mxu0 %v1420_v20 }
  0x8f   :  { %1851 = vmatprep.subr.mxu1 %v1420_v20  ;;  %1803 = vmatpush3.msra.mxu0 %v1420_v20 }
  0x90   :  { %1867 = vmatpush3.msra.mxu1 %v1420_v20  ;;  %1804 = vmatprep.subr.mxu0 %v1419_v22 }
  0x91   :  { %1852 = vmatprep.subr.mxu1 %v1419_v22  ;;  %1805 = vmatpush3.msra.mxu0 %v1419_v22 }
  0x92   :  { %1868 = vmatpush3.msra.mxu1 %v1419_v22  ;;  %1806 = vmatprep.subr.mxu0 %v1418_v23 }
  0x93   :  { %1853 = vmatprep.subr.mxu1 %v1418_v23  ;;  %1807 = vmatpush3.msra.mxu0 %v1418_v23 }
  0x94   :  { %1869 = vmatpush3.msra.mxu1 %v1418_v23  ;;  %1808 = vmatprep.subr.mxu0 %v1417_v11 }
  0x95   :  { %1854 = vmatprep.subr.mxu1 %v1417_v11  ;;  %1809 = vmatpush3.msra.mxu0 %v1417_v11 }
  0x96   :  { %1870 = vmatpush3.msra.mxu1 %v1417_v11  ;;  %1810 = vmatprep.subr.mxu0 %v1416_v24 }
  0x97   :  { %1855 = vmatprep.subr.mxu1 %v1416_v24  ;;  %1811 = vmatpush3.msra.mxu0 %v1416_v24 }
  0x98   :  { %1871 = vmatpush3.msra.mxu1 %v1416_v24  ;;  %1812 = vmatprep.subr.mxu0 %v1415_v25 }
  0x99   :  { %1856 = vmatprep.subr.mxu1 %v1415_v25  ;;  %1813 = vmatpush3.msra.mxu0 %v1415_v25 }
  0x9a   :  { %1872 = vmatpush3.msra.mxu1 %v1415_v25  ;;  %1814 = vmatprep.subr.mxu0 %v1414_v26 }
  0x9b   :  { %1857 = vmatprep.subr.mxu1 %v1414_v26  ;;  %1815 = vmatpush3.msra.mxu0 %v1414_v26 }
  0x9c   :  { %1873 = vmatpush3.msra.mxu1 %v1414_v26  ;;  %1816 = vmatprep.subr.mxu0 %v1413_v21 }
  0x9d   :  { %1858 = vmatprep.subr.mxu1 %v1413_v21  ;;  %1817 = vmatpush3.msra.mxu0 %v1413_v21 }
  0x9e   :  { %1874 = vmatpush3.msra.mxu1 %v1413_v21  ;;  %1818 = vmatprep.subr.mxu0 %v1412_v1 }
  0x9f   :  { %1859 = vmatprep.subr.mxu1 %v1412_v1  ;;  %1819 = vmatpush3.msra.mxu0 %v1412_v1 }
  0xa0   :  { %1875 = vmatpush3.msra.mxu1 %v1412_v1 }
 0x108   :  { %v1766_v0 = vpop.f32.mrf.mxu0 }
 0x109   :  { %v799_v2 = vadd.f32 %v1766_v0, %v2594_v60 }
 0x10a   :  { %v793_v14 = vpop.f32.mrf.mxu0 }
 0x10b   :  { %v873_v29 = vmax.f32 %v799_v2, 0.0  ;;  %v794_v30 = vadd.f32 %v2594_v60, %v793_v14 }
 0x10d   :  { %935 = vst [vmem:[#allocation3 + $0x38] sm:$0xff] %v873_v29  ;;  %v872_v32 = vmax.f32 %v794_v30, 0.0  ;;  %v1010_v9 = vmul.f32 %v2606_v31, %v873_v29  ;;  %v1327_v7 = vmul.f32 %v2651_v3, %v873_v29  ;;  %v1168_v12 = vmul.f32 %v2636_v55, %v873_v29 }
 0x10f   :  { %934 = vst [vmem:[#allocation3 + $0x20] sm:$0xff] %v872_v32  ;;  %v1769_v16 = vpop.f32.mrf.mxu0  ;;  %v1009_v58 = vmul.f32 %v2606_v31, %v872_v32  ;;  %v1167_v40 = vmul.f32 %v2636_v55, %v872_v32 }
 0x110   :  { %v809_v37 = vadd.f32 %v1769_v16, %v2594_v60 }
 0x111   :  { %v803_v17 = vpop.f32.mrf.mxu0 }
 0x112   :  { %v2623_v43 = vmax.f32 %v809_v37, 0.0  ;;  %v804_v45 = vadd.f32 %v2594_v60, %v803_v17 }
 0x114   :  { %937 = vst [vmem:[#allocation3 + $0x68] sm:$0xff] %v2623_v43  ;;  %v874_v46 = vmax.f32 %v804_v45, 0.0  ;;  %v1253_v48 = vld [vmem:[#allocation3 + $0x37] sm:$0xff]  ;;  %v1329_v0 = vmul.f32 %v2651_v3, %v2623_v43  ;;  %v1012_v17 = vmul.f32 %v2606_v31, %v2623_v43 }
 0x115   :  { %v973_v61 = vmul.f32 %v2600_v28, %v1253_v48  ;;  %v1115_v39 = vmul.f32 %v2630_v51, %v1253_v48  ;;  %v1359_v52 = vld [vmem:[#allocation3 + $0x39] sm:$0xff]  ;;  %v1274_v11 = vmul.f32 %v2658_v38, %v1253_v48 }
 0x116   :  { %v1093_v50 = vld [vmem:[#allocation3 + $0x1f] sm:$0xff]  ;;  %936 = vst [vmem:[#allocation3 + $0x50] sm:$0xff] %v874_v46  ;;  %v1380_v25 = vmul.f32 %v2668_v56, %v1359_v52  ;;  %v1221_v26 = vmul.f32 %v2646_v62, %v1359_v52  ;;  %v1063_v1 = vmul.f32 %v2618_v36, %v1359_v52  ;;  %v1328_v19 = vmul.f32 %v2651_v3, %v874_v46 }
 0x117   :  { %v1199_v18 = vld [vmem:[#allocation3 + $0x21] sm:$0xff]  ;;  %v1114_v53 = vmul.f32 %v2630_v51, %v1093_v50  ;;  %v972_v57 = vmul.f32 %v2600_v28, %v1093_v50  ;;  %v1772_v59 = vpop.f32.mrf.mxu0  ;;  %v1026_v13 = vadd.f32 %v1010_v9, %v973_v61  ;;  %v1011_v16 = vmul.f32 %v2606_v31, %v874_v46 }
 0x118   :  { %v819_v54 = vadd.f32 %v1772_v59, %v2594_v60  ;;  %v1062_v49 = vmul.f32 %v2618_v36, %v1199_v18  ;;  %v1220_v6 = vmul.f32 %v2646_v62, %v1199_v18 }
 0x119   :  { %v1130_v63 = vadd.f32 %v1114_v53, %v1077_v47  ;;  %v1025_v4 = vadd.f32 %v1009_v58, %v972_v57  ;;  %v813_v5 = vpop.f32.mrf.mxu0  ;;  %v1079_v32 = vadd.f32 %v1063_v1, %v1026_v13  ;;  %v1169_v47 = vmul.f32 %v2636_v55, %v874_v46 }
 0x11a   :  { %v2662_v10 = vmax.f32 %v819_v54, 0.0  ;;  %v814_v8 = vadd.f32 %v2594_v60, %v813_v5  ;;  %v1170_v58 = vmul.f32 %v2636_v55, %v2623_v43 }
 0x11b   :  { %v1183_v44 = vadd.f32 %v1167_v40, %v1130_v63  ;;  %v1078_v15 = vadd.f32 %v1062_v49, %v1025_v4  ;;  %v1255_v20 = vld [vmem:[#allocation3 + $0x67] sm:$0xff] }
 0x11c   :  { %939 = vst [vmem:[#allocation3 + $0x98] sm:$0xff] %v2662_v10  ;;  %v2673_v22 = vmax.f32 %v814_v8, 0.0  ;;  %v975_v30 = vmul.f32 %v2600_v28, %v1255_v20  ;;  %v1361_v48 = vld [vmem:[#allocation3 + $0x69] sm:$0xff]  ;;  %v1117_v63 = vmul.f32 %v2630_v51, %v1255_v20  ;;  %v1276_v5 = vmul.f32 %v2658_v38, %v1255_v20 }
 0x11d   :  { %v1236_v23 = vadd.f32 %v1220_v6, %v1183_v44  ;;  %v1131_v24 = vadd.f32 %v1115_v39, %v1078_v15  ;;  %v1254_v21 = vld [vmem:[#allocation3 + $0x4f] sm:$0xff]  ;;  %v1065_v6 = vmul.f32 %v2618_v36, %v1361_v48  ;;  %v1382_v43 = vmul.f32 %v2668_v56, %v1361_v48 }
 0x11e   :  { %938 = vst [vmem:[#allocation3 + $0x80] sm:$0xff] %v2673_v22  ;;  %v1360_v29 = vld [vmem:[#allocation3 + $0x51] sm:$0xff]  ;;  %v1116_v27 = vmul.f32 %v2630_v51, %v1254_v21  ;;  %v974_v35 = vmul.f32 %v2600_v28, %v1254_v21  ;;  %v1275_v42 = vmul.f32 %v2658_v38, %v1254_v21  ;;  %v1028_v59 = vadd.f32 %v1012_v17, %v975_v30 }
 0x11f   :  { %v1290_v2 = vadd.f32 %v1274_v11, %v1236_v23  ;;  %v1184_v14 = vadd.f32 %v1168_v12, %v1131_v24  ;;  %v1064_v18 = vmul.f32 %v2618_v36, %v1360_v29  ;;  %v1222_v61 = vmul.f32 %v2646_v62, %v1360_v29 }
 0x120   :  { %v1132_v45 = vadd.f32 %v1116_v27, %v1079_v32  ;;  %v1027_v50 = vadd.f32 %v1011_v16, %v974_v35  ;;  %v1381_v46 = vmul.f32 %v2668_v56, %v1360_v29  ;;  %v1081_v12 = vadd.f32 %v1065_v6, %v1028_v59 }
 0x121   :  { %v1343_v37 = vadd.f32 %v1327_v7, %v1290_v2  ;;  %v1237_v41 = vadd.f32 %v1221_v26, %v1184_v14  ;;  %v1223_v7 = vmul.f32 %v2646_v62, %v1361_v48  ;;  %v1171_v21 = vmul.f32 %v2636_v55, %v2673_v22 }
 0x122   :  { %v1185_v40 = vadd.f32 %v1169_v47, %v1132_v45  ;;  %v1080_v54 = vadd.f32 %v1064_v18, %v1027_v50  ;;  %v1013_v14 = vmul.f32 %v2606_v31, %v2673_v22  ;;  %v1330_v17 = vmul.f32 %v2651_v3, %v2673_v22 }
 0x123   :  { %v1396_v53 = vadd.f32 %v1380_v25, %v1343_v37  ;;  %v1291_v57 = vadd.f32 %v1275_v42, %v1237_v41  ;;  %v1257_v1 = vld [vmem:[#allocation3 + $0x97] sm:$0xff]  ;;  %v1331_v22 = vmul.f32 %v2651_v3, %v2662_v10 }
 0x124   :  { %v1238_v9 = vadd.f32 %v1222_v61, %v1185_v40  ;;  %v1133_v8 = vadd.f32 %v1117_v63, %v1080_v54  ;;  %v977_v45 = vmul.f32 %v2600_v28, %v1257_v1  ;;  %v1119_v50 = vmul.f32 %v2630_v51, %v1257_v1 }
 0x125   :  { %v1775_v4 = vpop.f32.mrf.mxu0  ;;  %1820 = vmatprep.mubr.f32.mxu0 %v1396_v53  ;;  %v1344_v49 = vadd.f32 %v1328_v19, %v1291_v57  ;;  %v1256_v44 = vld [vmem:[#allocation3 + $0x7f] sm:$0xff]  ;;  %v1172_v61 = vmul.f32 %v2636_v55, %v2662_v10 }
 0x126   :  { %v829_v39 = vadd.f32 %v1775_v4, %v2594_v60  ;;  %v1118_v13 = vmul.f32 %v2630_v51, %v1256_v44  ;;  %v1292_v11 = vadd.f32 %v1276_v5, %v1238_v9  ;;  %v1186_v24 = vadd.f32 %v1170_v58, %v1133_v8  ;;  %v1362_v25 = vld [vmem:[#allocation3 + $0x81] sm:$0xff]  ;;  %v1363_v57 = vld [vmem:[#allocation3 + $0x99] sm:$0xff] }
 0x127   :  { %v823_v52 = vpop.f32.mrf.mxu0  ;;  %v1397_v15 = vadd.f32 %v1381_v46, %v1344_v49  ;;  %v976_v2 = vmul.f32 %v2600_v28, %v1256_v44  ;;  %v1277_v32 = vmul.f32 %v2658_v38, %v1256_v44  ;;  %v1224_v35 = vmul.f32 %v2646_v62, %v1362_v25 }
 0x128   :  { %v2703_v23 = vmax.f32 %v829_v39, 0.0  ;;  %v824_v20 = vadd.f32 %v2594_v60, %v823_v52  ;;  %v1134_v26 = vadd.f32 %v1118_v13, %v1081_v12  ;;  %v1345_v29 = vadd.f32 %v1329_v0, %v1292_v11  ;;  %v958_v13 = vld [vmem:[#allocation3 + $0xf7] sm:$0xff] }
 0x129   :  { %1821 = vmatmul.mubr.f32.vlgmr.msra.gmra.mxu0 %v1397_v15  ;;  %v1239_v30 = vadd.f32 %v1223_v7, %v1186_v24  ;;  %v1029_v16 = vadd.f32 %v1013_v14, %v976_v2  ;;  %v1066_v37 = vmul.f32 %v2618_v36, %v1362_v25  ;;  %v1278_v0 = vmul.f32 %v2658_v38, %v1257_v1 }
 0x12a   :  { %941 = vst [vmem:[#allocation3 + $0xc8] sm:$0xff] %v2703_v23  ;;  %v878_v19 = vmax.f32 %v824_v20, 0.0  ;;  %v1187_v27 = vadd.f32 %v1171_v21, %v1134_v26  ;;  %v1398_v41 = vadd.f32 %v1382_v43, %v1345_v29  ;;  %v1383_v53 = vmul.f32 %v2668_v56, %v1362_v25 }
 0x12b   :  { %v1293_v42 = vadd.f32 %v1277_v32, %v1239_v30  ;;  %v1082_v48 = vadd.f32 %v1066_v37, %v1029_v16  ;;  %v1014_v58 = vmul.f32 %v2606_v31, %v2662_v10  ;;  %v1384_v49 = vmul.f32 %v2668_v56, %v1363_v57 }
 0x12c   :  { %940 = vst [vmem:[#allocation3 + $0xb0] sm:$0xff] %v878_v19  ;;  %v1240_v47 = vadd.f32 %v1224_v35, %v1187_v27  ;;  %1823 = vmatprep.mubr.f32.mxu0 %v1398_v41  ;;  %v1225_v5 = vmul.f32 %v2646_v62, %v1363_v57  ;;  %v1067_v39 = vmul.f32 %v2618_v36, %v1363_v57 }
 0x12d   :  { %v1346_v18 = vadd.f32 %v1330_v17, %v1293_v42  ;;  %v1135_v40 = vadd.f32 %v1119_v50, %v1082_v48  ;;  %v1030_v63 = vadd.f32 %v1014_v58, %v977_v45  ;;  %v1015_v25 = vmul.f32 %v2606_v31, %v878_v19  ;;  %v1048_v42 = vld [vmem:[#allocation3 + $0xf9] sm:$0xff] }
 0x12e   :  { %v1294_v59 = vadd.f32 %v1278_v0, %v1240_v47  ;;  %v1332_v21 = vmul.f32 %v2651_v3, %v878_v19  ;;  %v1173_v2 = vmul.f32 %v2636_v55, %v878_v19  ;;  %v979_v27 = vmul.f32 %v2600_v28, %v958_v13 }
 0x12f   :  { %v1399_v54 = vadd.f32 %v1383_v53, %v1346_v18  ;;  %v1188_v46 = vadd.f32 %v1172_v61, %v1135_v40  ;;  %v1083_v7 = vadd.f32 %v1067_v39, %v1030_v63  ;;  %v1260_v53 = vld [vmem:[#allocation3 + $0xdf] sm:$0xff]  ;;  %v1069_v40 = vmul.f32 %v2618_v36, %v1048_v42 }
 0x130   :  { %v1347_v4 = vadd.f32 %v1331_v22, %v1294_v59  ;;  %v1778_v6 = vpop.f32.mrf.mxu0  ;;  %v1174_v59 = vmul.f32 %v2636_v55, %v2703_v23  ;;  %v1032_v22 = vadd.f32 %v2613_v34, %v979_v27 }
 0x131   :  { %1824 = vmatmul.mubr.f32.gmra.mxu0 %v1399_v54  ;;  %v839_v9 = vadd.f32 %v1778_v6, %v2594_v60  ;;  %v1241_v8 = vadd.f32 %v1225_v5, %v1188_v46  ;;  %v1259_v14 = vld [vmem:[#allocation3 + $0xc7] sm:$0xff]  ;;  %v1281_v5 = vmul.f32 %v2658_v38, %v1260_v53 }
 0x132   :  { %v1400_v43 = vadd.f32 %v1384_v49, %v1347_v4  ;;  %v833_v52 = vpop.f32.mrf.mxu0  ;;  %v1121_v19 = vmul.f32 %v2630_v51, %v1259_v14  ;;  %v1280_v50 = vmul.f32 %v2658_v38, %v1259_v14  ;;  %v1365_v18 = vld [vmem:[#allocation3 + $0xc9] sm:$0xff]  ;;  %v1333_v4 = vmul.f32 %v2651_v3, %v2703_v23  ;;  %v1366_v6 = vld [vmem:[#allocation3 + $0xe1] sm:$0xff] }
 0x133   :  { %v1258_v44 = vld [vmem:[#allocation3 + $0xaf] sm:$0xff]  ;;  %v2733_v20 = vmax.f32 %v839_v9, 0.0  ;;  %v834_v11 = vadd.f32 %v2594_v60, %v833_v52  ;;  %v1227_v46 = vmul.f32 %v2646_v62, %v1365_v18  ;;  %v1386_v9 = vmul.f32 %v2668_v56, %v1365_v18 }
 0x134   :  { %v1279_v10 = vmul.f32 %v2658_v38, %v1258_v44  ;;  %v1364_v15 = vld [vmem:[#allocation3 + $0xb1] sm:$0xff]  ;;  %v1120_v12 = vmul.f32 %v2630_v51, %v1258_v44  ;;  %1826 = vmatprep.mubr.f32.mxu0 %v1400_v43  ;;  %v978_v24 = vmul.f32 %v2600_v28, %v1258_v44  ;;  %v2765_v44 = vmul.f32 %v2609_v33, %v2651_v3 }
 0x135   :  { %943 = vst [vmem:[#allocation3 + $0x128] sm:$0xff] %v2733_v20  ;;  %v880_v29 = vmax.f32 %v834_v11, 0.0  ;;  %v1068_v32 = vmul.f32 %v2618_v36, %v1364_v15  ;;  %v1385_v16 = vmul.f32 %v2668_v56, %v1364_v15  ;;  %v1226_v41 = vmul.f32 %v2646_v62, %v1364_v15 }
 0x136   :  { %v1295_v26 = vadd.f32 %v1279_v10, %v1241_v8  ;;  %v1136_v1 = vadd.f32 %v1120_v12, %v1083_v7  ;;  %v1031_v30 = vadd.f32 %v1015_v25, %v978_v24  ;;  %v1085_v23 = vadd.f32 %v1069_v40, %v1032_v22 }
 0x137   :  { %942 = vst [vmem:[#allocation3 + $0x110] sm:$0xff] %v880_v29  ;;  %v1781_v17 = vpop.f32.mrf.mxu0  ;;  %v1387_v10 = vmul.f32 %v2668_v56, %v1366_v6  ;;  %v1335_v12 = vmul.f32 %v2651_v3, %v2733_v20  ;;  %v1018_v14 = vmul.f32 %v2606_v31, %v2733_v20 }
 0x138   :  { %v1348_v35 = vadd.f32 %v1332_v21, %v1295_v26  ;;  %v1189_v37 = vadd.f32 %v1173_v2, %v1136_v1  ;;  %v1084_v45 = vadd.f32 %v1068_v32, %v1031_v30  ;;  %v849_v47 = vadd.f32 %v1781_v17, %v2594_v60 }
 0x139   :  { %v843_v57 = vpop.f32.mrf.mxu0  ;;  %v1017_v26 = vmul.f32 %v2606_v31, %v880_v29  ;;  %v1175_v1 = vmul.f32 %v2636_v55, %v880_v29  ;;  %v1176_v2 = vmul.f32 %v2636_v55, %v2733_v20 }
 0x13a   :  { %v1401_v0 = vadd.f32 %v1385_v16, %v1348_v35  ;;  %v1242_v48 = vadd.f32 %v1226_v41, %v1189_v37  ;;  %v1137_v58 = vadd.f32 %v1121_v19, %v1084_v45  ;;  %v2752_v61 = vmax.f32 %v849_v47, 0.0 }
 0x13b   :  { %v844_v54 = vadd.f32 %v2594_v60, %v843_v57 }
 0x13c   :  { %1827 = vmatmul.mubr.f32.gmra.mxu0 %v1401_v0  ;;  %v1296_v63 = vadd.f32 %v1280_v50, %v1242_v48  ;;  %v1190_v49 = vadd.f32 %v1174_v59, %v1137_v58  ;;  %945 = vst [vmem:[#allocation3 + $0x158] sm:$0xff] %v2752_v61  ;;  %v1261_v43 = vld [vmem:[#allocation3 + $0x127] sm:$0xff]  ;;  %v1337_v18 = vmul.f32 %v2651_v3, %v2752_v61 }
 0x13d   :  { %v2760_v34 = vmax.f32 %v844_v54, 0.0  ;;  %v981_v13 = vmul.f32 %v2600_v28, %v1261_v43  ;;  %v1367_v35 = vld [vmem:[#allocation3 + $0x129] sm:$0xff]  ;;  %v1123_v29 = vmul.f32 %v2630_v51, %v1261_v43  ;;  %v1178_v53 = vmul.f32 %v2636_v55, %v2752_v61 }
 0x13e   :  { %v1349_v39 = vadd.f32 %v1333_v4, %v1296_v63  ;;  %v1243_v8 = vadd.f32 %v1227_v46, %v1190_v49  ;;  %v1101_v15 = vld [vmem:[#allocation3 + $0x10f] sm:$0xff]  ;;  %v1071_v48 = vmul.f32 %v2618_v36, %v1367_v35  ;;  %v1282_v58 = vmul.f32 %v2658_v38, %v1261_v43 }
 0x13f   :  { %944 = vst [vmem:[#allocation3 + $0x140] sm:$0xff] %v2760_v34  ;;  %v1207_v7 = vld [vmem:[#allocation3 + $0x111] sm:$0xff]  ;;  %v1122_v25 = vmul.f32 %v2630_v51, %v1101_v15  ;;  %v980_v33 = vmul.f32 %v2600_v28, %v1101_v15  ;;  %v1034_v17 = vadd.f32 %v1018_v14, %v981_v13  ;;  %v1388_v59 = vmul.f32 %v2668_v56, %v1367_v35 }
 0x140   :  { %v1402_v52 = vadd.f32 %v1386_v9, %v1349_v39  ;;  %v1784_v11 = vpop.f32.mrf.mxu0  ;;  %v1297_v24 = vadd.f32 %v1281_v5, %v1243_v8  ;;  %v1070_v37 = vmul.f32 %v2618_v36, %v1207_v7  ;;  %v1228_v47 = vmul.f32 %v2646_v62, %v1207_v7 }
 0x141   :  { %v859_v21 = vadd.f32 %v1784_v11, %v2594_v60  ;;  %v1138_v27 = vadd.f32 %v1122_v25, %v1085_v23  ;;  %v1033_v16 = vadd.f32 %v1017_v26, %v980_v33  ;;  %v1229_v54 = vmul.f32 %v2646_v62, %v1367_v35 }
 0x142   :  { %1829 = vmatprep.mubr.f32.mxu1 %v1402_v52  ;;  %v853_v30 = vpop.f32.mrf.mxu0  ;;  %v1350_v32 = vadd.f32 %v2765_v44, %v1297_v24  ;;  %v1087_v4 = vadd.f32 %v1071_v48, %v1034_v17  ;;  %v1019_v46 = vmul.f32 %v2606_v31, %v2760_v34  ;;  %v1177_v23 = vmul.f32 %v2636_v55, %v2760_v34 }
 0x143   :  { %v2783_v41 = vmax.f32 %v859_v21, 0.0  ;;  %v854_v42 = vadd.f32 %v2594_v60, %v853_v30  ;;  %v1191_v19 = vadd.f32 %v1175_v1, %v1138_v27  ;;  %v1086_v20 = vadd.f32 %v1070_v37, %v1033_v16  ;;  %v1263_v50 = vld [vmem:[#allocation3 + $0x157] sm:$0xff] }
 0x144   :  { %v1403_v45 = vadd.f32 %v1387_v10, %v1350_v32  ;;  %v983_v9 = vmul.f32 %v2600_v28, %v1263_v50  ;;  %v1020_v52 = vmul.f32 %v2606_v31, %v2752_v61  ;;  %v1369_v7 = vld [vmem:[#allocation3 + $0x159] sm:$0xff]  ;;  %v1336_v24 = vmul.f32 %v2651_v3, %v2760_v34 }
 0x145   :  { %947 = vst [vmem:[#allocation3 + $0x188] sm:$0xff] %v2783_v41  ;;  %v2789_v0 = vmax.f32 %v854_v42, 0.0  ;;  %v1244_v57 = vadd.f32 %v1228_v47, %v1191_v19  ;;  %v1139_v22 = vadd.f32 %v1123_v29, %v1086_v20  ;;  %v1125_v26 = vmul.f32 %v2630_v51, %v1263_v50 }
 0x146   :  { %1830 = vmatmul.mubr.f32.vlgmr.msra.gmra.mxu1 %v1403_v45  ;;  %v1262_v40 = vld [vmem:[#allocation3 + $0x13f] sm:$0xff]  ;;  %v1036_v30 = vadd.f32 %v1020_v52, %v983_v9  ;;  %v1284_v32 = vmul.f32 %v2658_v38, %v1263_v50  ;;  %v1390_v27 = vmul.f32 %v2668_v56, %v1369_v7  ;;  %v1073_v29 = vmul.f32 %v2618_v36, %v1369_v7 }
 0x147   :  { %946 = vst [vmem:[#allocation3 + $0x170] sm:$0xff] %v2789_v0  ;;  %v1368_v63 = vld [vmem:[#allocation3 + $0x141] sm:$0xff]  ;;  %v1124_v49 = vmul.f32 %v2630_v51, %v1262_v40  ;;  %v1298_v5 = vadd.f32 %v1282_v58, %v1244_v57  ;;  %v1192_v6 = vadd.f32 %v1176_v2, %v1139_v22  ;;  %v982_v39 = vmul.f32 %v2600_v28, %v1262_v40 }
 0x148   :  { %v1283_v43 = vmul.f32 %v2658_v38, %v1262_v40  ;;  %v1072_v11 = vmul.f32 %v2618_v36, %v1368_v63  ;;  %v1230_v33 = vmul.f32 %v2646_v62, %v1368_v63  ;;  %v1389_v16 = vmul.f32 %v2668_v56, %v1368_v63 }
 0x149   :  { %v1140_v8 = vadd.f32 %v1124_v49, %v1087_v4  ;;  %v1351_v10 = vadd.f32 %v1335_v12, %v1298_v5  ;;  %v1245_v15 = vadd.f32 %v1229_v54, %v1192_v6  ;;  %v1035_v13 = vadd.f32 %v1019_v46, %v982_v39 }
 0x14a   :  { %v1787_v21 = vpop.f32.mrf.mxu0  ;;  %v1231_v47 = vmul.f32 %v2646_v62, %v1369_v7  ;;  %v1089_v57 = vadd.f32 %v1073_v29, %v1036_v30  ;;  %v1021_v63 = vmul.f32 %v2606_v31, %v2789_v0  ;;  %v1338_v9 = vmul.f32 %v2651_v3, %v2789_v0 }
 0x14b   :  { %v1193_v25 = vadd.f32 %v1177_v23, %v1140_v8  ;;  %v1404_v1 = vadd.f32 %v1388_v59, %v1351_v10  ;;  %v1299_v2 = vadd.f32 %v1283_v43, %v1245_v15  ;;  %v1088_v14 = vadd.f32 %v1072_v11, %v1035_v13 }
 0x14c   :  { %v869_v61 = vadd.f32 %v1787_v21, %v2594_v60  ;;  %v863_v35 = vpop.f32.mrf.mxu0  ;;  %v1265_v59 = vld [vmem:[#allocation3 + $0x187] sm:$0xff]  ;;  %v1022_v10 = vmul.f32 %v2606_v31, %v2783_v41 }
 0x14d   :  { %v1246_v12 = vadd.f32 %v1230_v33, %v1193_v25  ;;  %1832 = vmatprep.mubr.f32.mxu1 %v1404_v1  ;;  %v1352_v34 = vadd.f32 %v1336_v24, %v1299_v2  ;;  %v1141_v37 = vadd.f32 %v1125_v26, %v1088_v14  ;;  %v864_v45 = vadd.f32 %v2594_v60, %v863_v35  ;;  %v1371_v24 = vld [vmem:[#allocation3 + $0x189] sm:$0xff] }
 0x14e   :  { %v1264_v42 = vld [vmem:[#allocation3 + $0x16f] sm:$0xff]  ;;  %v2820_v17 = vmax.f32 %v869_v61, 0.0  ;;  %v1127_v52 = vmul.f32 %v2630_v51, %v1265_v59  ;;  %v1286_v11 = vmul.f32 %v2658_v38, %v1265_v59  ;;  %v1339_v1 = vmul.f32 %v2651_v3, %v2783_v41 }
 0x14f   :  { %v1300_v19 = vadd.f32 %v1284_v32, %v1246_v12  ;;  %v1405_v20 = vadd.f32 %v1389_v16, %v1352_v34  ;;  %v1194_v48 = vadd.f32 %v1178_v53, %v1141_v37  ;;  %v1370_v50 = vld [vmem:[#allocation3 + $0x171] sm:$0xff]  ;;  %v1126_v58 = vmul.f32 %v2630_v51, %v1264_v42 }
 0x150   :  { %949 = vst [vmem:[#allocation3 + $0x1b8] sm:$0xff] %v2820_v17  ;;  %v886_v22 = vmax.f32 %v864_v45, 0.0  ;;  %v984_v54 = vmul.f32 %v2600_v28, %v1264_v42  ;;  %v1285_v4 = vmul.f32 %v2658_v38, %v1264_v42  ;;  %v1179_v53 = vmul.f32 %v2636_v55, %v2789_v0 }
 0x151   :  { %v1353_v40 = vadd.f32 %v1337_v18, %v1300_v19  ;;  %1833 = vmatmul.mubr.f32.gmra.mxu1 %v1405_v20  ;;  %v1247_v60 = vadd.f32 %v1231_v47, %v1194_v48  ;;  %v1142_v49 = vadd.f32 %v1126_v58, %v1089_v57  ;;  %v1074_v6 = vmul.f32 %v2618_v36, %v1370_v50 }
 0x152   :  { %948 = vst [vmem:[#allocation3 + $0x1a0] sm:$0xff] %v886_v22  ;;  %v1037_v5 = vadd.f32 %v1021_v63, %v984_v54  ;;  %v985_v18 = vmul.f32 %v2600_v28, %v1265_v59  ;;  %v1232_v8 = vmul.f32 %v2646_v62, %v1370_v50  ;;  %v1391_v7 = vmul.f32 %v2668_v56, %v1370_v50 }
 0x153   :  { %v1406_v46 = vadd.f32 %v1390_v27, %v1353_v40  ;;  %v1301_v39 = vadd.f32 %v1285_v4, %v1247_v60  ;;  %v1195_v43 = vadd.f32 %v1179_v53, %v1142_v49  ;;  %v1180_v0 = vmul.f32 %v2636_v55, %v2783_v41 }
 0x154   :  { %v1090_v23 = vadd.f32 %v1074_v6, %v1037_v5  ;;  %v1038_v33 = vadd.f32 %v1022_v10, %v985_v18  ;;  %v1233_v14 = vmul.f32 %v2646_v62, %v1371_v24  ;;  %v1075_v30 = vmul.f32 %v2618_v36, %v1371_v24 }
 0x155   :  { %1835 = vmatprep.mubr.f32.mxu1 %v1406_v46  ;;  %v1354_v15 = vadd.f32 %v1338_v9, %v1301_v39  ;;  %v1248_v13 = vadd.f32 %v1232_v8, %v1195_v43  ;;  %v1392_v12 = vmul.f32 %v2668_v56, %v1371_v24  ;;  %v1023_v29 = vmul.f32 %v2606_v31, %v886_v22  ;;  %v1374_v43 = vld [vmem:[#allocation3 + $0x1d1] sm:$0xff] }
 0x156   :  { %v1143_v25 = vadd.f32 %v1127_v52, %v1090_v23  ;;  %v1091_v16 = vadd.f32 %v1075_v30, %v1038_v33  ;;  %v1340_v19 = vmul.f32 %v2651_v3, %v886_v22  ;;  %v1181_v20 = vmul.f32 %v2636_v55, %v886_v22  ;;  %v1268_v22 = vld [vmem:[#allocation3 + $0x1cf] sm:$0xff] }
 0x157   :  { %v1407_v26 = vadd.f32 %v1391_v7, %v1354_v15  ;;  %v1302_v21 = vadd.f32 %v1286_v11, %v1248_v13  ;;  %v1267_v48 = vld [vmem:[#allocation3 + $0x1b7] sm:$0xff]  ;;  %v1182_v46 = vmul.f32 %v2636_v55, %v2820_v17  ;;  %v1341_v5 = vmul.f32 %v2651_v3, %v2820_v17 }
 0x158   :  { %v1196_v2 = vadd.f32 %v1180_v0, %v1143_v25  ;;  %v1129_v31 = vmul.f32 %v2630_v51, %v1267_v48  ;;  %v1288_v4 = vmul.f32 %v2658_v38, %v1267_v48  ;;  %v1373_v49 = vld [vmem:[#allocation3 + $0x1b9] sm:$0xff]  ;;  %v1395_v10 = vmul.f32 %v2668_v56, %v1374_v43 }
 0x159   :  { %1836 = vmatmul.mubr.f32.gmra.mxu1 %v1407_v26  ;;  %v1355_v61 = vadd.f32 %v1339_v1, %v1302_v21  ;;  %v1266_v32 = vld [vmem:[#allocation3 + $0x19f] sm:$0xff]  ;;  %v1235_v18 = vmul.f32 %v2646_v62, %v1373_v49  ;;  %v1394_v9 = vmul.f32 %v2668_v56, %v1373_v49 }
 0x15a   :  { %v1249_v27 = vadd.f32 %v1233_v14, %v1196_v2  ;;  %v1287_v35 = vmul.f32 %v2658_v38, %v1266_v32  ;;  %v1372_v34 = vld [vmem:[#allocation3 + $0x1a1] sm:$0xff]  ;;  %v1128_v37 = vmul.f32 %v2630_v51, %v1266_v32  ;;  %v986_v41 = vmul.f32 %v2600_v28, %v1266_v32 }
 0x15b   :  { %v1408_v42 = vadd.f32 %v1392_v12, %v1355_v61  ;;  %v1076_v57 = vmul.f32 %v2618_v36, %v1372_v34  ;;  %v1393_v59 = vmul.f32 %v2668_v56, %v1372_v34  ;;  %v1234_v54 = vmul.f32 %v2646_v62, %v1372_v34  ;;  %v2872_v62 = vld [vmem:[%s2899_s6] ss:$0 sm:$0xff]  ;;  %s1904_s6 = smov [#allocation4]  }
 0x15c   :  { %v1303_v45 = vadd.f32 %v1287_v35, %v1249_v27  ;;  %v1144_v47 = vadd.f32 %v1128_v37, %v1091_v16  ;;  %v1039_v50 = vadd.f32 %v1023_v29, %v986_v41  ;;  %v1289_v51 = vmul.f32 %v2658_v38, %v1268_v22  ;;  %s1617_s24 = sshll.u32 %s1904_s6, 4  ;;  %s1618_s24 = int_to_ptr.vmem [resolvable:$true] %s1617_s24 }
 0x15d   :  { %1838 = vmatprep.mubr.f32.mxu1 %v1408_v42  ;;  %s1881_s0 = scalar_lea.vmem %s1618_s24, 2048  ;;  %p1886_p1 = scmp.lt.s32.totalorder %s1618_s24, %s1618_s24 }
 0x15e   :  { %v1356_v58 = vadd.f32 %v1340_v19, %v1303_v45  ;;  %v1197_v40 = vadd.f32 %v1181_v20, %v1144_v47  ;;  %v1092_v28 = vadd.f32 %v1076_v57, %v1039_v50  ;;  %p1882_p0 = scmp.ne.s32.totalorder %s1618_s24, %s1881_s0  ;;  %p1887_p2 = scmp.lt.s32.totalorder %s1881_s0, %s1881_s0 }
 0x160   :  { %v1409_v63 = vadd.f32 %v1393_v59, %v1356_v58  ;;  %v1250_v60 = vadd.f32 %v1234_v54, %v1197_v40  ;;  %v1145_v53 = vadd.f32 %v1129_v31, %v1092_v28  ;;  %p1888_p3 = por %p1887_p2, %p1886_p1 }
 0x162   :  { %1839 = vmatmul.mubr.f32.gmra.mxu1 %v1409_v63  ;;  %v1304_v36 = vadd.f32 %v1288_v4, %v1250_v60  ;;  %v1198_v6 = vadd.f32 %v1182_v46, %v1145_v53  ;;  %p1889_p4 = pnand %p1888_p3, %p1882_p0 }
 0x164   :  { %v1357_v39 = vadd.f32 %v1341_v5, %v1304_v36  ;;  %v1251_v8 = vadd.f32 %v1235_v18, %v1198_v6 }
 0x166   :  { %v1410_v23 = vadd.f32 %v1394_v9, %v1357_v39  ;;  %v1305_v52 = vadd.f32 %v1289_v51, %v1251_v8 }
 0x168   :  { %1841 = vmatprep.mubr.f32.mxu1 %v1410_v23  ;;  %v1358_v55 = vadd.f32 %v2765_v44, %v1305_v52 }
 0x16a   :  { %v1411_v15 = vadd.f32 %v1395_v10, %v1358_v55 }
 0x16c   :  { %1842 = vmatmul.mubr.f32.gmra.mxu1 %v1411_v15 }
 0x1e9   :  { %v1822_v3 = vpop.f32.mrf.mxu0 }
 0x1ea   :  { %v1507_v38 = vadd.f32 %v1822_v3, %v2872_v62 }
 0x1eb   :  { %v1501_v17 = vpop.f32.mrf.mxu0 }
 0x1ec   :  { %v1581_v7 = vmax.f32 %v1507_v38, 0.0  ;;  %v1502_v13 = vadd.f32 %v2872_v62, %v1501_v17 }
 0x1ee   :  { %1597 = vst [vmem:[#allocation4 + $0x8] sm:$0xff] %v1581_v7  ;;  %v1580_v11 = vmax.f32 %v1502_v13, 0.0 }
 0x1f0   :  { %1596 = vst [vmem:[#allocation4] sm:$0xff] %v1580_v11 }
 0x1f1   :  { %v1825_v56 = vpop.f32.mrf.mxu0 }
 0x1f2   :  { %v1517_v44 = vadd.f32 %v1825_v56, %v2872_v62 }
 0x1f3   :  { %v1511_v24 = vpop.f32.mrf.mxu0 }
 0x1f4   :  { %v1583_v25 = vmax.f32 %v1517_v44, 0.0  ;;  %v1512_v0 = vadd.f32 %v2872_v62, %v1511_v24 }
 0x1f6   :  { %1599 = vst [vmem:[#allocation4 + $0x18] sm:$0xff] %v1583_v25  ;;  %v1582_v33 = vmax.f32 %v1512_v0, 0.0 }
 0x1f8   :  { %1598 = vst [vmem:[#allocation4 + $0x10] sm:$0xff] %v1582_v33 }
 0x1fc   :  { %v1828_v26 = vpop.f32.mrf.mxu0 }
 0x1fd   :  { %v1527_v21 = vadd.f32 %v1828_v26, %v2872_v62 }
 0x1fe   :  { %v1521_v1 = vpop.f32.mrf.mxu0 }
 0x1ff   :  { %v1585_v2 = vmax.f32 %v1527_v21, 0.0  ;;  %v1522_v14 = vadd.f32 %v2872_v62, %v1521_v1 }
 0x201   :  { %1601 = vst [vmem:[#allocation4 + $0x28] sm:$0xff] %v1585_v2  ;;  %v1584_v30 = vmax.f32 %v1522_v14, 0.0 }
 0x203   :  { %1600 = vst [vmem:[#allocation4 + $0x20] sm:$0xff] %v1584_v30 }
 0x206   :  { %v1831_v61 = vpop.f32.mrf.mxu1 }
 0x207   :  { %v1537_v12 = vadd.f32 %v1831_v61, %v2872_v62 }
 0x208   :  { %v1531_v32 = vpop.f32.mrf.mxu1 }
 0x209   :  { %v1587_v27 = vmax.f32 %v1537_v12, 0.0  ;;  %v1532_v35 = vadd.f32 %v2872_v62, %v1531_v32 }
 0x20b   :  { %1603 = vst [vmem:[#allocation4 + $0x38] sm:$0xff] %v1587_v27  ;;  %v1586_v34 = vmax.f32 %v1532_v35, 0.0 }
 0x20d   :  { %1602 = vst [vmem:[#allocation4 + $0x30] sm:$0xff] %v1586_v34 }
 0x211   :  { %v1834_v16 = vpop.f32.mrf.mxu1 }
 0x212   :  { %v1547_v37 = vadd.f32 %v1834_v16, %v2872_v62 }
 0x213   :  { %v1541_v42 = vpop.f32.mrf.mxu1 }
 0x214   :  { %v1589_v41 = vmax.f32 %v1547_v37, 0.0  ;;  %v1542_v29 = vadd.f32 %v2872_v62, %v1541_v42 }
 0x216   :  { %1605 = vst [vmem:[#allocation4 + $0x48] sm:$0xff] %v1589_v41  ;;  %v1588_v45 = vmax.f32 %v1542_v29, 0.0 }
 0x218   :  { %1604 = vst [vmem:[#allocation4 + $0x40] sm:$0xff] %v1588_v45 }
 0x219   :  { %v1837_v19 = vpop.f32.mrf.mxu1 }
 0x21a   :  { %v1557_v47 = vadd.f32 %v1837_v19, %v2872_v62 }
 0x21b   :  { %v1551_v20 = vpop.f32.mrf.mxu1 }
 0x21c   :  { %v1591_v48 = vmax.f32 %v1557_v47, 0.0  ;;  %v1552_v50 = vadd.f32 %v2872_v62, %v1551_v20 }
 0x21e   :  { %1607 = vst [vmem:[#allocation4 + $0x58] sm:$0xff] %v1591_v48  ;;  %v1590_v57 = vmax.f32 %v1552_v50, 0.0 }
 0x220   :  { %1606 = vst [vmem:[#allocation4 + $0x50] sm:$0xff] %v1590_v57 }
 0x222   :  { %v1840_v58 = vpop.f32.mrf.mxu1 }
 0x223   :  { %v1567_v59 = vadd.f32 %v1840_v58, %v2872_v62 }
 0x224   :  { %v1561_v40 = vpop.f32.mrf.mxu1 }
 0x225   :  { %v1593_v54 = vmax.f32 %v1567_v59, 0.0  ;;  %v1562_v28 = vadd.f32 %v2872_v62, %v1561_v40 }
 0x227   :  { %1609 = vst [vmem:[#allocation4 + $0x68] sm:$0xff] %v1593_v54  ;;  %v1592_v31 = vmax.f32 %v1562_v28, 0.0 }
 0x229   :  { %1608 = vst [vmem:[#allocation4 + $0x60] sm:$0xff] %v1592_v31 }
 0x22c   :  { %v1843_v63 = vpop.f32.mrf.mxu1 }
 0x22d   :  { %v1577_v60 = vadd.f32 %v1843_v63, %v2872_v62 }
 0x22e   :  { %v1571_v4 = vpop.f32.mrf.mxu1 }
 0x22f   :  { %v1595_v49 = vmax.f32 %v1577_v60, 0.0  ;;  %v1572_v22 = vadd.f32 %v2872_v62, %v1571_v4 }
 0x231   :  { %1611 = vst [vmem:[#allocation4 + $0x78] sm:$0xff] %v1595_v49  ;;  %v1594_v53 = vmax.f32 %v1572_v22, 0.0 }
 0x233   :  { %1610 = vst [vmem:[#allocation4 + $0x70] sm:$0xff] %v1594_v53 }
 0x234   :  { %1892 = shalt.err (!%p1889_p4)
}
 0x235   :  { %s1905_s25 = smov 128   ;;  %s1906_s26 = smov 8  }
 0x236   :  { %1623 = dma.vmem_to_hbm [thread:$0]  %s1618_s24, 2048, %s2900_s7, [#allocation5], %s1905_s25, %s1905_s25, %s1906_s26  }
 0x237   :  { %1901 = dma.done.wait [#allocation5], 2048  }
 0x238   :  { %1902 = vsyncadd [#allocation5], 4294965248 }
 0x239   :  { %1627 = vsyncpa [#allocation5], 1 }

</bundles_post_ra>
